<compile_context>
chip_gen: v6e
topology: v6e:2x2x1
jax: 0.10.0
libtpu: 0.0.40
codegen_flags: <defaults>
</compile_context>

<pallas_src>
import functools

import jax
import jax.numpy as jnp
from jax.experimental import pallas as pl
from jax.experimental.pallas import tpu as pltpu

IN_DIM = 28 * 28
DIMS = [IN_DIM, 200, 100, 50, 100, 200, IN_DIM]        # true layer sizes
PAD_DIMS = [IN_DIM, 256, 128, 128, 128, 256, IN_DIM]   # lane-padded internal sizes
RELU_LAYERS = (True, True, False, True, True, False)   # e1, e2, e3, d1, d2, d3


def _round_up(x, m):
    return ((x + m - 1) // m) * m


def _choose_tile(B, batch_tile):
    """Batch tile: multiple of 8 (sublane), <= batch_tile, and small enough that
    the grid has >= 2 'parallel' steps when B >= 16 (v7x megacore). B <= 8 uses a
    single full-batch block (block dims equal to the array dims, no padding)."""
    if B <= 8:
        return B
    tile = min(batch_tile,                 # VMEM / per-step cap
               _round_up((B + 1) // 2, 8),  # >= 2 grid steps
               (B // 8) * 8)                # tile <= B, multiple of 8
    return max(tile, 8)


def autoencoder_kernel(x_ref,
                       w1, b1, w2, b2, w3, b3, w4, b4, w5, b5, w6, b6,
                       o_ref):
    """Fused 6-layer MLP forward for one batch tile.

    All matmuls hit the MXU with bf16 operands and f32 accumulation; bias add and
    ReLU run in f32 (v5e VPU has no bf16), then activations are re-quantized to
    bf16 before feeding the next matmul. Padded weight columns / biases are zero,
    so padded lanes stay exactly 0 and the result matches the unpadded math.
    """

    def layer(h, w_ref, b_ref, relu, to_bf16):
        y = jnp.dot(h, w_ref[...], preferred_element_type=jnp.float32)
        y = y + b_ref[...]
        if relu:
            y = jnp.maximum(y, 0.0)
        return y.astype(jnp.bfloat16) if to_bf16 else y

    h = x_ref[...].astype(jnp.bfloat16)          # single cast straight to matmul dtype
    h = layer(h, w1, b1, RELU_LAYERS[0], True)
    h = layer(h, w2, b2, RELU_LAYERS[1], True)
    h = layer(h, w3, b3, RELU_LAYERS[2], True)
    h = layer(h, w4, b4, RELU_LAYERS[3], True)
    h = layer(h, w5, b5, RELU_LAYERS[4], True)
    h = layer(h, w6, b6, RELU_LAYERS[5], False)  # final layer stays f32
    o_ref[...] = h.astype(o_ref.dtype)


def init_params(key):
    """nn.Linear-style init (U[-1/sqrt(fan_in), +1/sqrt(fan_in)]), true shapes, f32.

    W is stored as (in, out) so the kernel computes x @ W (== PyTorch x @ W.T).
    """
    params = []
    for i in range(6):
        fan_in, fan_out = DIMS[i], DIMS[i + 1]
        key, kw, kb = jax.random.split(key, 3)
        bound = 1.0 / jnp.sqrt(fan_in)
        w = jax.random.uniform(kw, (fan_in, fan_out), jnp.float32, -bound, bound)
        b = jax.random.uniform(kb, (1, fan_out), jnp.float32, -bound, bound)
        params.append((w, b))
    return params


def pack_params(params, weight_dtype=jnp.bfloat16):
    """Zero-pad every layer to PAD_DIMS (lane multiples) and cast weights to bf16.

    Padded weight columns and biases are zero, so padded activation lanes are
    exactly 0.0 and contribute nothing downstream -> numerically exact.
    Biases stay f32 (added to the f32 accumulator).
    """
    flat = []
    for i, (w, b) in enumerate(params):
        pin, pout = PAD_DIMS[i], PAD_DIMS[i + 1]
        wp = jnp.zeros((pin, pout), weight_dtype)
        wp = wp.at[: w.shape[0], : w.shape[1]].set(w.astype(weight_dtype))
        bp = jnp.zeros((1, pout), jnp.float32)
        bp = bp.at[:, : b.shape[1]].set(b)
        flat.extend([wp, bp])
    return flat


@functools.partial(jax.jit, static_argnames=("batch_tile", "out_dtype"))
def autoencoder_forward(x, packed_params, batch_tile=512, out_dtype=None):
    B = x.shape[0]
    out_dtype = x.dtype if out_dtype is None else out_dtype
    xf = x.reshape(B, IN_DIM)          # contiguous -> metadata-only reshape

    tile = _choose_tile(B, batch_tile)
    grid = (pl.cdiv(B, tile),)         # non-divisible grids use partial last block

    in_specs = [pl.BlockSpec((tile, IN_DIM), lambda i: (i, 0))]
    for p in packed_params:
        # Whole weight / bias block with a constant index_map -> stays VMEM-resident
        # across grid steps (<1 MiB total in bf16).
        in_specs.append(pl.BlockSpec(p.shape, lambda i: (0, 0)))

    out = pl.pallas_call(
        autoencoder_kernel,
        out_shape=jax.ShapeDtypeStruct((B, IN_DIM), out_dtype),
        grid_spec=pltpu.PrefetchScalarGridSpec(
            num_scalar_prefetch=0,
            grid=grid,
            in_specs=in_specs,
            out_specs=pl.BlockSpec((tile, IN_DIM), lambda i: (i, 0)),
        ),
        compiler_params=pltpu.CompilerParams(
            dimension_semantics=("parallel",),
            vmem_limit_bytes=32 * 1024 * 1024,
        ),
    )(xf, *packed_params)

    return out.reshape(B, 1, 28, 28)


def reference_forward(x, params, out_dtype=None):
    """Plain-JAX reference mirroring the kernel numerics
    (bf16 matmul operands / inter-layer activations, f32 accumulation, bias, ReLU)."""
    out_dtype = x.dtype if out_dtype is None else out_dtype
    h = x.reshape(x.shape[0], IN_DIM).astype(jnp.bfloat16)
    for i, ((w, b), relu) in enumerate(zip(params, RELU_LAYERS)):
        y = jnp.dot(h, w.astype(jnp.bfloat16),
                    preferred_element_type=jnp.float32) + b
        if relu:
            y = jnp.maximum(y, 0.0)
        h = y.astype(jnp.bfloat16) if i < len(params) - 1 else y
    return h.reshape(x.shape[0], 1, 28, 28).astype(out_dtype)


if __name__ == "__main__":
    key = jax.random.PRNGKey(0)
    key, kx1, kx2 = jax.random.split(key, 3)

    params = init_params(key)
    packed = pack_params(params)

    # 1) Small f32 batch (module-consistent NCHW input), single grid step.
    x_small = jax.random.normal(kx1, (2, 1, 28, 28), jnp.float32)
    out_small = jax.block_until_ready(autoencoder_forward(x_small, packed))
    ref_small = reference_forward(x_small, params)
    assert out_small.shape == (2, 1, 28, 28) and out_small.dtype == jnp.float32
    assert jnp.allclose(out_small, ref_small, atol=2e-2, rtol=2e-2)

    # 2) bf16-I/O fast path with >=2 "parallel" grid steps and a partial last
    #    block, no padding: B=40 -> tile=24, grid=(2,).
    x_bf = jax.random.normal(kx2, (40, 1, 28, 28), jnp.bfloat16)
    out_bf = jax.block_until_ready(
        autoencoder_forward(x_bf, packed, out_dtype=jnp.bfloat16))
    ref_bf = reference_forward(x_bf, params, out_dtype=jnp.bfloat16)
    assert out_bf.shape == (40, 1, 28, 28) and out_bf.dtype == jnp.bfloat16
    assert jnp.allclose(out_bf.astype(jnp.float32), ref_bf.astype(jnp.float32),
                        atol=3e-2, rtol=3e-2)

    print("KERNEL_OK")
</pallas_src>

<mosaic_0001>
module attributes {stable_mosaic.version = 11 : i64} {
  func.func @autoencoder_kernel(%arg0: i32, %arg1: memref<2x784xf32, #tpu.memory_space<vmem>>, %arg2: memref<784x256xbf16, #tpu.memory_space<vmem>>, %arg3: memref<1x256xf32, #tpu.memory_space<vmem>>, %arg4: memref<256x128xbf16, #tpu.memory_space<vmem>>, %arg5: memref<1x128xf32, #tpu.memory_space<vmem>>, %arg6: memref<128x128xbf16, #tpu.memory_space<vmem>>, %arg7: memref<1x128xf32, #tpu.memory_space<vmem>>, %arg8: memref<128x128xbf16, #tpu.memory_space<vmem>>, %arg9: memref<1x128xf32, #tpu.memory_space<vmem>>, %arg10: memref<128x256xbf16, #tpu.memory_space<vmem>>, %arg11: memref<1x256xf32, #tpu.memory_space<vmem>>, %arg12: memref<256x784xbf16, #tpu.memory_space<vmem>>, %arg13: memref<1x784xf32, #tpu.memory_space<vmem>>, %arg14: memref<2x784xf32, #tpu.memory_space<vmem>>) attributes {dimension_semantics = [#tpu.dimension_semantics<parallel>], iteration_bounds = array<i64: 1>, scalar_prefetch = 0 : i64, scratch_operands = 0 : i64, tpu.core_type = #tpu.core_type<tc>, window_params = [{transform_indices = @transform_0, window_bounds = array<i64: 2, 784>}, {pipeline_mode = #tpu.pipeline_mode<synchronous>, transform_indices = @transform_1, window_bounds = array<i64: 784, 256>}, {pipeline_mode = #tpu.pipeline_mode<synchronous>, transform_indices = @transform_2, window_bounds = array<i64: 1, 256>}, {pipeline_mode = #tpu.pipeline_mode<synchronous>, transform_indices = @transform_3, window_bounds = array<i64: 256, 128>}, {pipeline_mode = #tpu.pipeline_mode<synchronous>, transform_indices = @transform_4, window_bounds = array<i64: 1, 128>}, {pipeline_mode = #tpu.pipeline_mode<synchronous>, transform_indices = @transform_5, window_bounds = array<i64: 128, 128>}, {pipeline_mode = #tpu.pipeline_mode<synchronous>, transform_indices = @transform_6, window_bounds = array<i64: 1, 128>}, {pipeline_mode = #tpu.pipeline_mode<synchronous>, transform_indices = @transform_7, window_bounds = array<i64: 128, 128>}, {pipeline_mode = #tpu.pipeline_mode<synchronous>, transform_indices = @transform_8, window_bounds = array<i64: 1, 128>}, {pipeline_mode = #tpu.pipeline_mode<synchronous>, transform_indices = @transform_9, window_bounds = array<i64: 128, 256>}, {pipeline_mode = #tpu.pipeline_mode<synchronous>, transform_indices = @transform_10, window_bounds = array<i64: 1, 256>}, {pipeline_mode = #tpu.pipeline_mode<synchronous>, transform_indices = @transform_11, window_bounds = array<i64: 256, 784>}, {pipeline_mode = #tpu.pipeline_mode<synchronous>, transform_indices = @transform_12, window_bounds = array<i64: 1, 784>}, {transform_indices = @transform_13, window_bounds = array<i64: 2, 784>}]} {
    %c0 = arith.constant 0 : index
    %c0_0 = arith.constant 0 : index
    %0 = vector.load %arg1[%c0, %c0_0] : memref<2x784xf32, #tpu.memory_space<vmem>>, vector<2x784xf32>
    %1 = arith.truncf %0 : vector<2x784xf32> to vector<2x784xbf16>
    %c0_1 = arith.constant 0 : index
    %c0_2 = arith.constant 0 : index
    %2 = vector.load %arg2[%c0_1, %c0_2] : memref<784x256xbf16, #tpu.memory_space<vmem>>, vector<784x256xbf16>
    %cst = arith.constant dense<0.000000e+00> : vector<2x256xf32>
    %3 = tpu.matmul %1, %2, %cst {dimension_numbers = #tpu.dot_dimension_numbers<[1], [0], [0], [1], [0, 0, 1, 1], [], []>} : vector<2x784xbf16>, vector<784x256xbf16>, vector<2x256xf32> -> vector<2x256xf32>
    %c0_3 = arith.constant 0 : index
    %c0_4 = arith.constant 0 : index
    %4 = vector.load %arg3[%c0_3, %c0_4] : memref<1x256xf32, #tpu.memory_space<vmem>>, vector<1x256xf32>
    %5 = vector.broadcast %4 : vector<1x256xf32> to vector<2x256xf32>
    %6 = arith.addf %3, %5 : vector<2x256xf32>
    %cst_5 = arith.constant 0.000000e+00 : f32
    %7 = vector.broadcast %cst_5 : f32 to vector<2x256xf32>
    %8 = arith.maximumf %6, %7 : vector<2x256xf32>
    %9 = arith.truncf %8 : vector<2x256xf32> to vector<2x256xbf16>
    %c0_6 = arith.constant 0 : index
    %c0_7 = arith.constant 0 : index
    %10 = vector.load %arg4[%c0_6, %c0_7] : memref<256x128xbf16, #tpu.memory_space<vmem>>, vector<256x128xbf16>
    %cst_8 = arith.constant dense<0.000000e+00> : vector<2x128xf32>
    %11 = tpu.matmul %9, %10, %cst_8 {dimension_numbers = #tpu.dot_dimension_numbers<[1], [0], [0], [1], [0, 0, 1, 1], [], []>} : vector<2x256xbf16>, vector<256x128xbf16>, vector<2x128xf32> -> vector<2x128xf32>
    %c0_9 = arith.constant 0 : index
    %c0_10 = arith.constant 0 : index
    %12 = vector.load %arg5[%c0_9, %c0_10] : memref<1x128xf32, #tpu.memory_space<vmem>>, vector<1x128xf32>
    %13 = vector.broadcast %12 : vector<1x128xf32> to vector<2x128xf32>
    %14 = arith.addf %11, %13 : vector<2x128xf32>
    %cst_11 = arith.constant 0.000000e+00 : f32
    %15 = vector.broadcast %cst_11 : f32 to vector<2x128xf32>
    %16 = arith.maximumf %14, %15 : vector<2x128xf32>
    %17 = arith.truncf %16 : vector<2x128xf32> to vector<2x128xbf16>
    %c0_12 = arith.constant 0 : index
    %c0_13 = arith.constant 0 : index
    %18 = vector.load %arg6[%c0_12, %c0_13] : memref<128x128xbf16, #tpu.memory_space<vmem>>, vector<128x128xbf16>
    %cst_14 = arith.constant dense<0.000000e+00> : vector<2x128xf32>
    %19 = tpu.matmul %17, %18, %cst_14 {dimension_numbers = #tpu.dot_dimension_numbers<[1], [0], [0], [1], [0, 0, 1, 1], [], []>} : vector<2x128xbf16>, vector<128x128xbf16>, vector<2x128xf32> -> vector<2x128xf32>
    %c0_15 = arith.constant 0 : index
    %c0_16 = arith.constant 0 : index
    %20 = vector.load %arg7[%c0_15, %c0_16] : memref<1x128xf32, #tpu.memory_space<vmem>>, vector<1x128xf32>
    %21 = vector.broadcast %20 : vector<1x128xf32> to vector<2x128xf32>
    %22 = arith.addf %19, %21 : vector<2x128xf32>
    %23 = arith.truncf %22 : vector<2x128xf32> to vector<2x128xbf16>
    %c0_17 = arith.constant 0 : index
    %c0_18 = arith.constant 0 : index
    %24 = vector.load %arg8[%c0_17, %c0_18] : memref<128x128xbf16, #tpu.memory_space<vmem>>, vector<128x128xbf16>
    %cst_19 = arith.constant dense<0.000000e+00> : vector<2x128xf32>
    %25 = tpu.matmul %23, %24, %cst_19 {dimension_numbers = #tpu.dot_dimension_numbers<[1], [0], [0], [1], [0, 0, 1, 1], [], []>} : vector<2x128xbf16>, vector<128x128xbf16>, vector<2x128xf32> -> vector<2x128xf32>
    %c0_20 = arith.constant 0 : index
    %c0_21 = arith.constant 0 : index
    %26 = vector.load %arg9[%c0_20, %c0_21] : memref<1x128xf32, #tpu.memory_space<vmem>>, vector<1x128xf32>
    %27 = vector.broadcast %26 : vector<1x128xf32> to vector<2x128xf32>
    %28 = arith.addf %25, %27 : vector<2x128xf32>
    %cst_22 = arith.constant 0.000000e+00 : f32
    %29 = vector.broadcast %cst_22 : f32 to vector<2x128xf32>
    %30 = arith.maximumf %28, %29 : vector<2x128xf32>
    %31 = arith.truncf %30 : vector<2x128xf32> to vector<2x128xbf16>
    %c0_23 = arith.constant 0 : index
    %c0_24 = arith.constant 0 : index
    %32 = vector.load %arg10[%c0_23, %c0_24] : memref<128x256xbf16, #tpu.memory_space<vmem>>, vector<128x256xbf16>
    %cst_25 = arith.constant dense<0.000000e+00> : vector<2x256xf32>
    %33 = tpu.matmul %31, %32, %cst_25 {dimension_numbers = #tpu.dot_dimension_numbers<[1], [0], [0], [1], [0, 0, 1, 1], [], []>} : vector<2x128xbf16>, vector<128x256xbf16>, vector<2x256xf32> -> vector<2x256xf32>
    %c0_26 = arith.constant 0 : index
    %c0_27 = arith.constant 0 : index
    %34 = vector.load %arg11[%c0_26, %c0_27] : memref<1x256xf32, #tpu.memory_space<vmem>>, vector<1x256xf32>
    %35 = vector.broadcast %34 : vector<1x256xf32> to vector<2x256xf32>
    %36 = arith.addf %33, %35 : vector<2x256xf32>
    %cst_28 = arith.constant 0.000000e+00 : f32
    %37 = vector.broadcast %cst_28 : f32 to vector<2x256xf32>
    %38 = arith.maximumf %36, %37 : vector<2x256xf32>
    %39 = arith.truncf %38 : vector<2x256xf32> to vector<2x256xbf16>
    %c0_29 = arith.constant 0 : index
    %c0_30 = arith.constant 0 : index
    %40 = vector.load %arg12[%c0_29, %c0_30] : memref<256x784xbf16, #tpu.memory_space<vmem>>, vector<256x784xbf16>
    %cst_31 = arith.constant dense<0.000000e+00> : vector<2x784xf32>
    %41 = tpu.matmul %39, %40, %cst_31 {dimension_numbers = #tpu.dot_dimension_numbers<[1], [0], [0], [1], [0, 0, 1, 1], [], []>} : vector<2x256xbf16>, vector<256x784xbf16>, vector<2x784xf32> -> vector<2x784xf32>
    %c0_32 = arith.constant 0 : index
    %c0_33 = arith.constant 0 : index
    %42 = vector.load %arg13[%c0_32, %c0_33] : memref<1x784xf32, #tpu.memory_space<vmem>>, vector<1x784xf32>
    %43 = vector.broadcast %42 : vector<1x784xf32> to vector<2x784xf32>
    %44 = arith.addf %41, %43 : vector<2x784xf32>
    %c0_34 = arith.constant 0 : index
    %c0_35 = arith.constant 0 : index
    %45 = vector.load %arg14[%c0_34, %c0_35] : memref<2x784xf32, #tpu.memory_space<vmem>>, vector<2x784xf32>
    tpu.vector_store %arg14[%c0_34, %c0_35], %44 {strides = array<i32>} : memref<2x784xf32, #tpu.memory_space<vmem>>, vector<2x784xf32>,
    return
  }
  func.func @transform_0(%arg0: i32) -> (i32, i32) {
    %c0_i32 = arith.constant 0 : i32
    %c0_i32_0 = arith.constant 0 : i32
    return %arg0, %c0_i32 : i32, i32
  }
  func.func @transform_1(%arg0: i32) -> (i32, i32) {
    %c0_i32 = arith.constant 0 : i32
    %c0_i32_0 = arith.constant 0 : i32
    %c0_i32_1 = arith.constant 0 : i32
    return %c0_i32, %c0_i32_0 : i32, i32
  }
  func.func @transform_2(%arg0: i32) -> (i32, i32) {
    %c0_i32 = arith.constant 0 : i32
    %c0_i32_0 = arith.constant 0 : i32
    %c0_i32_1 = arith.constant 0 : i32
    return %c0_i32, %c0_i32_0 : i32, i32
  }
  func.func @transform_3(%arg0: i32) -> (i32, i32) {
    %c0_i32 = arith.constant 0 : i32
    %c0_i32_0 = arith.constant 0 : i32
    %c0_i32_1 = arith.constant 0 : i32
    return %c0_i32, %c0_i32_0 : i32, i32
  }
  func.func @transform_4(%arg0: i32) -> (i32, i32) {
    %c0_i32 = arith.constant 0 : i32
    %c0_i32_0 = arith.constant 0 : i32
    %c0_i32_1 = arith.constant 0 : i32
    return %c0_i32, %c0_i32_0 : i32, i32
  }
  func.func @transform_5(%arg0: i32) -> (i32, i32) {
    %c0_i32 = arith.constant 0 : i32
    %c0_i32_0 = arith.constant 0 : i32
    %c0_i32_1 = arith.constant 0 : i32
    return %c0_i32, %c0_i32_0 : i32, i32
  }
  func.func @transform_6(%arg0: i32) -> (i32, i32) {
    %c0_i32 = arith.constant 0 : i32
    %c0_i32_0 = arith.constant 0 : i32
    %c0_i32_1 = arith.constant 0 : i32
    return %c0_i32, %c0_i32_0 : i32, i32
  }
  func.func @transform_7(%arg0: i32) -> (i32, i32) {
    %c0_i32 = arith.constant 0 : i32
    %c0_i32_0 = arith.constant 0 : i32
    %c0_i32_1 = arith.constant 0 : i32
    return %c0_i32, %c0_i32_0 : i32, i32
  }
  func.func @transform_8(%arg0: i32) -> (i32, i32) {
    %c0_i32 = arith.constant 0 : i32
    %c0_i32_0 = arith.constant 0 : i32
    %c0_i32_1 = arith.constant 0 : i32
    return %c0_i32, %c0_i32_0 : i32, i32
  }
  func.func @transform_9(%arg0: i32) -> (i32, i32) {
    %c0_i32 = arith.constant 0 : i32
    %c0_i32_0 = arith.constant 0 : i32
    %c0_i32_1 = arith.constant 0 : i32
    return %c0_i32, %c0_i32_0 : i32, i32
  }
  func.func @transform_10(%arg0: i32) -> (i32, i32) {
    %c0_i32 = arith.constant 0 : i32
    %c0_i32_0 = arith.constant 0 : i32
    %c0_i32_1 = arith.constant 0 : i32
    return %c0_i32, %c0_i32_0 : i32, i32
  }
  func.func @transform_11(%arg0: i32) -> (i32, i32) {
    %c0_i32 = arith.constant 0 : i32
    %c0_i32_0 = arith.constant 0 : i32
    %c0_i32_1 = arith.constant 0 : i32
    return %c0_i32, %c0_i32_0 : i32, i32
  }
  func.func @transform_12(%arg0: i32) -> (i32, i32) {
    %c0_i32 = arith.constant 0 : i32
    %c0_i32_0 = arith.constant 0 : i32
    %c0_i32_1 = arith.constant 0 : i32
    return %c0_i32, %c0_i32_0 : i32, i32
  }
  func.func @transform_13(%arg0: i32) -> (i32, i32) {
    %c0_i32 = arith.constant 0 : i32
    %c0_i32_0 = arith.constant 0 : i32
    return %arg0, %c0_i32 : i32, i32
  }
}

</mosaic_0001>

<bundles_post_ra>
// kernel: autoencoder_forward.1
= control target key start
LH: loop header
LB: loop body
LE: loop exit
PB: predicated region body
PF: predicated region fallthrough
CT: control target
= control target key end

     0   :  { %v3113_v35 = vmov 1983009808   ;;  %v53_v37 = vlaneseq  ;;  %vm696_vm0 = vcmask 130048   ;;  %vm3116_vm1 = vmmov 0   ;;  %s4053_s1 = inlined_call_operand.vmem [shape: bf16[784,256], index: 1, kind: input, shape index: {}]   ;;  %s4054_s0 = inlined_call_operand.vmem [shape: f32[2,784], index: 0, kind: input, shape index: {}]   ;;  %s4055_s3 = inlined_call_operand.vmem [shape: bf16[256,128], index: 3, kind: input, shape index: {}]   ;;  %s4056_s5 = inlined_call_operand.vmem [shape: bf16[128,128], index: 5, kind: input, shape index: {}]   ;;  %s4057_s2 = inlined_call_operand.vmem [shape: f32[1,256], index: 2, kind: input, shape index: {}]   ;;  %s4058_s7 = inlined_call_operand.vmem [shape: bf16[128,128], index: 7, kind: input, shape index: {}]   ;;  %s4059_s4 = inlined_call_operand.vmem [shape: f32[1,128], index: 4, kind: input, shape index: {}]   ;;  %s4060_s9 = inlined_call_operand.vmem [shape: bf16[128,256], index: 9, kind: input, shape index: {}]   ;;  %s4061_s6 = inlined_call_operand.vmem [shape: f32[1,128], index: 6, kind: input, shape index: {}]   ;;  %s4062_s11 = inlined_call_operand.vmem [shape: bf16[256,784], index: 11, kind: input, shape index: {}]   ;;  %s4063_s8 = inlined_call_operand.vmem [shape: f32[1,128], index: 8, kind: input, shape index: {}]   ;;  %s4064_s10 = inlined_call_operand.vmem [shape: f32[1,256], index: 10, kind: input, shape index: {}]   ;;  %s4065_s12 = inlined_call_operand.vmem [shape: f32[1,784], index: 12, kind: input, shape index: {}]   ;;  %s4066_s13 = inlined_call_operand.vmem [shape: f32[2,784], index: 13, kind: output, shape index: {}]  }
   0x1   :  { %v2748_v0 = vld [vmem:[%s4053_s1 + $0x74] ss:$8 sps:$4 sm:$0xff]   ;;  %v2750_v1 = vld [vmem:[%s4053_s1 + $0x70] ss:$8 sps:$4 sm:$0xff]   ;;  %v2754_v4 = vld [vmem:[%s4053_s1 + $0x64] ss:$8 sps:$4 sm:$0xff]   ;;  %v51_v36 = vunpack.c.l.s4 %v3113_v35 }
   0x2   :  { %700 = vmatprep.subr.bf16.mxu0 %v2748_v0  ;;  %v2751_v2 = vld [vmem:[%s4053_s1 + $0x174] ss:$8 sps:$4 sm:$0xff]   ;;  %v2753_v3 = vld [vmem:[%s4053_s1 + $0x170] ss:$8 sps:$4 sm:$0xff]   ;;  %v2756_v5 = vld [vmem:[%s4053_s1 + $0x60] ss:$8 sps:$4 sm:$0xff]  }
   0x3   :  { %701 = vmatpush1.bf16.msra.mxu0 %v2750_v1  ;;  %741 = vmatprep.subr.bf16.mxu1 %v2751_v2  ;;  %v2757_v6 = vld [vmem:[%s4053_s1 + $0x164] ss:$8 sps:$4 sm:$0xff]   ;;  %v2759_v7 = vld [vmem:[%s4053_s1 + $0x160] ss:$8 sps:$4 sm:$0xff]   ;;  %v2760_v8 = vld [vmem:[%s4053_s1 + $0x54] ss:$8 sps:$4 sm:$0xff]   ;;  %v52_v42 = vunpack.c.0.s8 %v51_v36 }
   0x4   :  { %742 = vmatpush1.bf16.msra.mxu1 %v2753_v3  ;;  %702 = vmatprep.subr.bf16.mxu0 %v2754_v4  ;;  %v2762_v9 = vld [vmem:[%s4053_s1 + $0x50] ss:$8 sps:$4 sm:$0xff]   ;;  %v2763_v10 = vld [vmem:[%s4053_s1 + $0x154] ss:$8 sps:$4 sm:$0xff]   ;;  %v2766_v11 = vld [vmem:[%s4053_s1 + $0x44] ss:$8 sps:$4 sm:$0xff]  }
   0x5   :  { %743 = vmatprep.subr.bf16.mxu1 %v2757_v6  ;;  %v2765_v12 = vld [vmem:[%s4053_s1 + $0x150] ss:$8 sps:$4 sm:$0xff]   ;;  %v2769_v13 = vld [vmem:[%s4053_s1 + $0x144] ss:$8 sps:$4 sm:$0xff]   ;;  %v2768_v14 = vld [vmem:[%s4053_s1 + $0x40] ss:$8 sps:$4 sm:$0xff]  }
   0x6   :  { %v2772_v15 = vld [vmem:[%s4053_s1 + $0x34] ss:$8 sps:$4 sm:$0xff]   ;;  %v2771_v16 = vld [vmem:[%s4053_s1 + $0x140] ss:$8 sps:$4 sm:$0xff]   ;;  %v2774_v18 = vld [vmem:[%s4053_s1 + $0x30] ss:$8 sps:$4 sm:$0xff]  }
   0x7   :  { %703 = vmatpush1.bf16.msra.mxu0 %v2756_v5  ;;  %v2775_v17 = vld [vmem:[%s4053_s1 + $0x134] ss:$8 sps:$4 sm:$0xff]   ;;  %v2778_v19 = vld [vmem:[%s4053_s1 + $0x24] ss:$8 sps:$4 sm:$0xff]   ;;  %v2777_v20 = vld [vmem:[%s4053_s1 + $0x130] ss:$8 sps:$4 sm:$0xff]  }
   0x8   :  { %704 = vmatprep.subr.bf16.mxu0 %v2760_v8  ;;  %744 = vmatpush1.bf16.msra.mxu1 %v2759_v7  ;;  %v2781_v21 = vld [vmem:[%s4053_s1 + $0x124] ss:$8 sps:$4 sm:$0xff]   ;;  %v2780_v22 = vld [vmem:[%s4053_s1 + $0x20] ss:$8 sps:$4 sm:$0xff]   ;;  %v2784_v23 = vld [vmem:[%s4053_s1 + $0x14] ss:$8 sps:$4 sm:$0xff]  }
   0x9   :  { %745 = vmatprep.subr.bf16.mxu1 %v2763_v10  ;;  %v2783_v24 = vld [vmem:[%s4053_s1 + $0x120] ss:$8 sps:$4 sm:$0xff]   ;;  %v2787_v25 = vld [vmem:[%s4053_s1 + $0x114] ss:$8 sps:$4 sm:$0xff]   ;;  %v2786_v26 = vld [vmem:[%s4053_s1 + $0x10] ss:$8 sps:$4 sm:$0xff]  }
   0xa   :  { %v2790_v27 = vld [vmem:[%s4053_s1 + $0x4] ss:$8 sps:$4 sm:$0xff]   ;;  %v2789_v28 = vld [vmem:[%s4053_s1 + $0x110] ss:$8 sps:$4 sm:$0xff]   ;;  %v2792_v30 = vld [vmem:[%s4053_s1] ss:$8 sps:$4 sm:$0xff]  }
   0xb   :  { %705 = vmatpush1.bf16.msra.mxu0 %v2762_v9  ;;  %v2793_v29 = vld [vmem:[%s4053_s1 + $0x104] ss:$8 sps:$4 sm:$0xff]   ;;  %v2796_v31 = vld [vmem:[%s4053_s1 + $0xf4] ss:$8 sps:$4 sm:$0xff]   ;;  %v2795_v32 = vld [vmem:[%s4053_s1 + $0x100] ss:$8 sps:$4 sm:$0xff]  }
   0xc   :  { %706 = vmatprep.subr.bf16.mxu0 %v2766_v11  ;;  %746 = vmatpush1.bf16.msra.mxu1 %v2765_v12  ;;  %v2799_v33 = vld [vmem:[%s4053_s1 + $0x1f4] ss:$8 sps:$4 sm:$0xff]   ;;  %v2798_v34 = vld [vmem:[%s4053_s1 + $0xf0] ss:$8 sps:$4 sm:$0xff]   ;;  %v2802_v38 = vld [vmem:[%s4053_s1 + $0xe4] ss:$8 sps:$4 sm:$0xff]  }
   0xd   :  { %747 = vmatprep.subr.bf16.mxu1 %v2769_v13  ;;  %v2801_v39 = vld [vmem:[%s4053_s1 + $0x1f0] ss:$8 sps:$4 sm:$0xff]   ;;  %v2805_v40 = vld [vmem:[%s4053_s1 + $0x1e4] ss:$8 sps:$4 sm:$0xff]   ;;  %v2804_v41 = vld [vmem:[%s4053_s1 + $0xe0] ss:$8 sps:$4 sm:$0xff]  }
   0xe   :  { %v3304_v43 = vshrl.u32 %v53_v37, 7  ;;  %v2808_v44 = vld [vmem:[%s4053_s1 + $0xd4] ss:$8 sps:$4 sm:$0xff]   ;;  %v2807_v45 = vld [vmem:[%s4053_s1 + $0x1e0] ss:$8 sps:$4 sm:$0xff]   ;;  %vm2370_vm2 = vcmask 1041408  }
   0xf   :  { %707 = vmatpush1.bf16.msra.mxu0 %v2768_v14  ;;  %v2811_v46 = vld [vmem:[%s4053_s1 + $0x1d4] ss:$8 sps:$4 sm:$0xff]   ;;  %v2810_v47 = vld [vmem:[%s4053_s1 + $0xd0] ss:$8 sps:$4 sm:$0xff]   ;;  %v2814_v49 = vld [vmem:[%s4053_s1 + $0xc4] ss:$8 sps:$4 sm:$0xff]  }
  0x10   :  { %708 = vmatprep.subr.bf16.mxu0 %v2772_v15  ;;  %748 = vmatpush1.bf16.msra.mxu1 %v2771_v16  ;;  %v3319_v48 = vsub.s32 %v52_v42, %v3304_v43  ;;  %v2813_v50 = vld [vmem:[%s4053_s1 + $0x1d0] ss:$8 sps:$4 sm:$0xff]   ;;  %v2817_v51 = vld [vmem:[%s4053_s1 + $0x1c4] ss:$8 sps:$4 sm:$0xff]   ;;  %v2816_v53 = vld [vmem:[%s4053_s1 + $0xc0] ss:$8 sps:$4 sm:$0xff]  }
  0x11   :  { %749 = vmatprep.subr.bf16.mxu1 %v2775_v17  ;;  %v45_v52 = vld [vmem:[%s4054_s0] sm:$0xff]  ;;  %v2820_v56 = vld [vmem:[%s4053_s1 + $0xb4] ss:$8 sps:$4 sm:$0xff]   ;;  %v2822_v61 = vld [vmem:[%s4053_s1 + $0xb0] ss:$8 sps:$4 sm:$0xff]   ;;  %vm2371_vm3 = vcmask 1043458  }
  0x12   :  { %v56_v54 = vrot.slane %v45_v52, %v3319_v48  ;;  %v49_v55 = vcombine.high %v45_v52, %v45_v52  ;;  %v2819_v57 = vld [vmem:[%s4053_s1 + $0x1c0] ss:$8 sps:$4 sm:$0xff]   ;;  %v2823_v60 = vld [vmem:[%s4053_s1 + $0x1b4] ss:$8 sps:$4 sm:$0xff]   ;;  %v2826_v0 = vld [vmem:[%s4053_s1 + $0xa4] ss:$8 sps:$4 sm:$0xff]  }
  0x13   :  { %709 = vmatpush1.bf16.msra.mxu0 %v2774_v18  ;;  %v2825_v1 = vld [vmem:[%s4053_s1 + $0x1b0] ss:$8 sps:$4 sm:$0xff]   ;;  %v2829_v3 = vld [vmem:[%s4053_s1 + $0x1a4] ss:$8 sps:$4 sm:$0xff]   ;;  %v2828_v4 = vld [vmem:[%s4053_s1 + $0xa0] ss:$8 sps:$4 sm:$0xff]  }
  0x14   :  { %710 = vmatprep.subr.bf16.mxu0 %v2778_v19  ;;  %750 = vmatpush1.bf16.msra.mxu1 %v2777_v20  ;;  %v64_v58 = vcombine.high %v56_v54, %v56_v54  ;;  %v63_v59 = vrot.slane %v49_v55, %v3319_v48  ;;  %v2832_v5 = vld [vmem:[%s4053_s1 + $0x94] ss:$8 sps:$4 sm:$0xff]   ;;  %v2831_v6 = vld [vmem:[%s4053_s1 + $0x1a0] ss:$8 sps:$4 sm:$0xff]   ;;  %v2834_v9 = vld [vmem:[%s4053_s1 + $0x90] ss:$8 sps:$4 sm:$0xff]   ;;  %v89_v18 = vpack.c.bf16 %v56_v54, %v56_v54 }
  0x15   :  { %751 = vmatprep.subr.bf16.mxu1 %v2781_v21  ;;  %v2835_v7 = vld [vmem:[%s4053_s1 + $0x194] ss:$8 sps:$4 sm:$0xff]   ;;  %v46_v8 = vld [vmem:[%s4054_s0 + $0x8] sm:$0x3f]  ;;  %v2837_v12 = vld [vmem:[%s4053_s1 + $0x190] ss:$8 sps:$4 sm:$0xff]  }
  0x16   :  { %v90_v62 = vpack.c.bf16 %v64_v58, %v64_v58  ;;  %v65_v63 = vcombine.high %v63_v59, %v63_v59  ;;  %v3378_v10 = vrot.slane %v46_v8, %v3319_v48  ;;  %v2838_v11 = vld [vmem:[%s4053_s1 + $0x84] ss:$8 sps:$4 sm:$0xff]   ;;  %v2840_v14 = vld [vmem:[%s4053_s1 + $0x80] ss:$8 sps:$4 sm:$0xff]   ;;  %v2847_v16 = vld [vmem:[%s4053_s1 + $0x274] ss:$8 sps:$4 sm:$0xff]   ;;  %v66_v21 = vcombine.high %v46_v8, %v46_v8 }
  0x17   :  { %711 = vmatpush1.bf16.msra.mxu0 %v2780_v22  ;;  %v2841_v13 = vld [vmem:[%s4053_s1 + $0x184] ss:$8 sps:$4 sm:$0xff]   ;;  %v2844_v17 = vld [vmem:[%s4053_s1 + $0x180] ss:$8 sps:$4 sm:$0xff]   ;;  %v2845_v19 = vld [vmem:[%s4053_s1 + $0x270] ss:$8 sps:$4 sm:$0xff]   ;;  %v91_v22 = vpack.c.bf16 %v63_v59, %v63_v59 }
  0x18   :  { %712 = vmatprep.subr.bf16.mxu0 %v2784_v23  ;;  %752 = vmatpush1.bf16.msra.mxu1 %v2783_v24  ;;  %v92_v2 = vpack.c.bf16 %v65_v63, %v65_v63  ;;  %v81_v15 = vcombine.high %v3378_v10, %v3378_v10  ;;  %v2851_v23 = vld [vmem:[%s4053_s1 + $0x264] ss:$8 sps:$4 sm:$0xff]   ;;  %v2858_v35 = vld [vmem:[%s4053_s1 + $0x230] ss:$8 sps:$4 sm:$0xff]   ;;  %v2861_v37 = vld [vmem:[%s4053_s1 + $0x220] ss:$8 sps:$4 sm:$0xff]  }
  0x19   :  { %753 = vmatprep.subr.bf16.mxu1 %v2787_v25  ;;  %732 = vmatprep.mubr.bf16.mxu0 %v90_v62  ;;  %v2893_v24 = vld [vmem:[%s4053_s1 + $0x304] ss:$8 sps:$4 sm:$0xff]   ;;  %v2891_v25 = vld [vmem:[%s4053_s1 + $0x300] ss:$8 sps:$4 sm:$0xff]   ;;  %v2872_v42 = vld [vmem:[%s4053_s1 + $0x2f4] ss:$8 sps:$4 sm:$0xff]  }
  0x1a   :  { %773 = vmatprep.mubr.bf16.mxu1 %v92_v2  ;;  %v94_v20 = vpack.c.bf16 %v81_v15, %v81_v15  ;;  %v2863_v36 = vld [vmem:[%s4053_s1 + $0x224] ss:$8 sps:$4 sm:$0xff]   ;;  %v2884_v52 = vld [vmem:[%s4053_s1 + $0x2b4] ss:$8 sps:$4 sm:$0xff]   ;;  %v2885_v55 = vld [vmem:[%s4053_s1 + $0x2a0] ss:$8 sps:$4 sm:$0xff]  }
  0x1b   :  { %713 = vmatpush1.bf16.msra.mxu0 %v2786_v26  ;;  %v2849_v26 = vld [vmem:[%s4053_s1 + $0x260] ss:$8 sps:$4 sm:$0xff]   ;;  %v2887_v54 = vld [vmem:[%s4053_s1 + $0x2a4] ss:$8 sps:$4 sm:$0xff]   ;;  %v2898_v62 = vld [vmem:[%s4055_s3 + $0x38] sm:$0xff]   ;;  %vm2373_vm5 = vcmask 128004  }
  0x1c   :  { %714 = vmatprep.subr.bf16.mxu0 %v2790_v27  ;;  %754 = vmatpush1.bf16.msra.mxu1 %v2789_v28  ;;  %v80_v27 = vrot.slane %v66_v21, %v3319_v48  ;;  %v2854_v28 = vld [vmem:[%s4053_s1 + $0x254] ss:$8 sps:$4 sm:$0xff]   ;;  %v2896_v58 = vld [vmem:[%s4053_s1 + $0x284] ss:$8 sps:$4 sm:$0xff]   ;;  %v2894_v59 = vld [vmem:[%s4053_s1 + $0x280] ss:$8 sps:$4 sm:$0xff]  }
  0x1d   :  { %755 = vmatprep.subr.bf16.mxu1 %v2793_v29  ;;  %v3114_v29 = vmov 0   ;;  %v2899_v63 = vld [vmem:[%s4055_s3 + $0x70] sm:$0xff]   ;;  %v2902_v2 = vld [vmem:[%s4055_s3 + $0x28] sm:$0xff]   ;;  %vm2372_vm4 = vmor %vm2371_vm3, %vm2370_vm2 }
  0x1e   :  { %v2908_v8 = vld [vmem:[%s4055_s3 + $0x10] sm:$0xff]   ;;  %vm2374_vm6 = vmor %vm2373_vm5, %vm2372_vm4 }
  0x1f   :  { %715 = vmatpush1.bf16.msra.mxu0 %v2792_v30  ;;  %v2852_v30 = vld [vmem:[%s4053_s1 + $0x250] ss:$8 sps:$4 sm:$0xff]  }
  0x20   :  { %716 = vmatprep.subr.bf16.mxu0 %v2796_v31  ;;  %756 = vmatpush1.bf16.msra.mxu1 %v2795_v32  ;;  %v95_v31 = vpack.c.bf16 %v80_v27, %v80_v27  ;;  %v2857_v32 = vld [vmem:[%s4053_s1 + $0x244] ss:$8 sps:$4 sm:$0xff]   ;;  %v194_v27 = vld [vmem:[%s4057_s2] sm:$0x3] }
  0x21   :  { %757 = vmatprep.subr.bf16.mxu1 %v2799_v33  ;;  %v2855_v33 = vld [vmem:[%s4053_s1 + $0x240] ss:$8 sps:$4 sm:$0xff]  }
  0x23   :  { %717 = vmatpush2.bf16.msra.mxu0 %v2798_v34  ;;  %v2860_v34 = vld [vmem:[%s4053_s1 + $0x234] ss:$8 sps:$4 sm:$0xff]  }
  0x24   :  { %718 = vmatprep.subr.bf16.mxu0 %v2802_v38  ;;  %758 = vmatpush2.bf16.msra.mxu1 %v2801_v39  ;;  %v2866_v38 = vld [vmem:[%s4053_s1 + $0x214] ss:$8 sps:$4 sm:$0xff]   ;;  %v2864_v39 = vld [vmem:[%s4053_s1 + $0x210] ss:$8 sps:$4 sm:$0xff]  }
  0x25   :  { %759 = vmatprep.subr.bf16.mxu1 %v2805_v40  ;;  %v2869_v40 = vld [vmem:[%s4053_s1 + $0x204] ss:$8 sps:$4 sm:$0xff]  }
  0x27   :  { %719 = vmatpush2.bf16.msra.mxu0 %v2804_v41  ;;  %v2867_v41 = vld [vmem:[%s4053_s1 + $0x200] ss:$8 sps:$4 sm:$0xff]  }
  0x28   :  { %720 = vmatprep.subr.bf16.mxu0 %v2808_v44  ;;  %760 = vmatpush2.bf16.msra.mxu1 %v2807_v45  ;;  %v2870_v44 = vld [vmem:[%s4053_s1 + $0x2f0] ss:$8 sps:$4 sm:$0xff]   ;;  %v2875_v45 = vld [vmem:[%s4053_s1 + $0x2e4] ss:$8 sps:$4 sm:$0xff]  }
  0x29   :  { %761 = vmatprep.subr.bf16.mxu1 %v2811_v46  ;;  %v2873_v46 = vld [vmem:[%s4053_s1 + $0x2e0] ss:$8 sps:$4 sm:$0xff]  }
  0x2b   :  { %721 = vmatpush2.bf16.msra.mxu0 %v2810_v47  ;;  %v2878_v47 = vld [vmem:[%s4053_s1 + $0x2d4] ss:$8 sps:$4 sm:$0xff]  }
  0x2c   :  { %722 = vmatprep.subr.bf16.mxu0 %v2814_v49  ;;  %762 = vmatpush2.bf16.msra.mxu1 %v2813_v50  ;;  %v2876_v49 = vld [vmem:[%s4053_s1 + $0x2d0] ss:$8 sps:$4 sm:$0xff]   ;;  %v2881_v50 = vld [vmem:[%s4053_s1 + $0x2c4] ss:$8 sps:$4 sm:$0xff]  }
  0x2d   :  { %763 = vmatprep.subr.bf16.mxu1 %v2817_v51  ;;  %v2879_v51 = vld [vmem:[%s4053_s1 + $0x2c0] ss:$8 sps:$4 sm:$0xff]  }
  0x2f   :  { %723 = vmatpush2.bf16.msra.mxu0 %v2816_v53  ;;  %v2882_v53 = vld [vmem:[%s4053_s1 + $0x2b0] ss:$8 sps:$4 sm:$0xff]  }
  0x30   :  { %724 = vmatprep.subr.bf16.mxu0 %v2820_v56  ;;  %764 = vmatpush2.bf16.msra.mxu1 %v2819_v57  ;;  %v2890_v56 = vld [vmem:[%s4053_s1 + $0x294] ss:$8 sps:$4 sm:$0xff]   ;;  %v2888_v57 = vld [vmem:[%s4053_s1 + $0x290] ss:$8 sps:$4 sm:$0xff]  }
  0x31   :  { %765 = vmatprep.subr.bf16.mxu1 %v2823_v60  ;;  %v93_v60 = vpack.c.bf16 %v3378_v10, %v3378_v10  ;;  %v2910_v10 = vld [vmem:[%s4055_s3 + $0x8] sm:$0xff]  }
  0x33   :  { %725 = vmatpush2.bf16.msra.mxu0 %v2822_v61  ;;  %v2897_v61 = vld [vmem:[%s4055_s3 + $0x78] sm:$0xff]  }
  0x34   :  { %726 = vmatprep.subr.bf16.mxu0 %v2826_v0  ;;  %766 = vmatpush2.bf16.msra.mxu1 %v2825_v1  ;;  %v2900_v0 = vld [vmem:[%s4055_s3 + $0x30] sm:$0xff]   ;;  %v2901_v1 = vld [vmem:[%s4055_s3 + $0x68] sm:$0xff]  }
  0x35   :  { %767 = vmatprep.subr.bf16.mxu1 %v2829_v3  ;;  %v2903_v3 = vld [vmem:[%s4055_s3 + $0x60] sm:$0xff]  }
  0x37   :  { %727 = vmatpush2.bf16.msra.mxu0 %v2828_v4  ;;  %v2904_v4 = vld [vmem:[%s4055_s3 + $0x20] sm:$0xff]  }
  0x38   :  { %728 = vmatprep.subr.bf16.mxu0 %v2832_v5  ;;  %768 = vmatpush2.bf16.msra.mxu1 %v2831_v6  ;;  %v2905_v5 = vld [vmem:[%s4055_s3 + $0x58] sm:$0xff]  }
  0x39   :  { %769 = vmatprep.subr.bf16.mxu1 %v2835_v7  ;;  %v2906_v6 = vld [vmem:[%s4055_s3 + $0x18] sm:$0xff]   ;;  %v2907_v7 = vld [vmem:[%s4055_s3 + $0x50] sm:$0xff]  }
  0x3b   :  { %729 = vmatpush2.bf16.msra.mxu0 %v2834_v9  ;;  %v2909_v9 = vld [vmem:[%s4055_s3 + $0x48] sm:$0xff]  }
  0x3c   :  { %730 = vmatprep.subr.bf16.mxu0 %v2838_v11  ;;  %770 = vmatpush2.bf16.msra.mxu1 %v2837_v12  ;;  %v2911_v11 = vld [vmem:[%s4055_s3 + $0x40] sm:$0xff]  }
  0x3d   :  { %771 = vmatprep.subr.bf16.mxu1 %v2841_v13  ;;  %v2912_v12 = vld [vmem:[%s4055_s3] sm:$0xff]   ;;  %v3115_v13 = vmov 0.0  }
  0x3f   :  { %731 = vmatpush2.bf16.msra.mxu0 %v2840_v14 }
  0x40   :  { %782 = vmatprep.subr.bf16.mxu0 %v2847_v16  ;;  %772 = vmatpush2.bf16.msra.mxu1 %v2844_v17 }
  0x41   :  { %837 = vmatprep.subr.bf16.mxu1 %v2893_v24 }
  0x42   :  { %733 = vmatmul.mubr.bf16.vlgmr.msra.gmra.mxu0 %v89_v18 }
  0x43   :  { %783 = vmatpush1.bf16.msra.mxu0 %v2845_v19  ;;  %814 = vmatprep.mubr.bf16.mxu0 %v94_v20 }
  0x44   :  { %774 = vmatmul.mubr.bf16.vlgmr.msra.gmra.mxu1 %v91_v22  ;;  %784 = vmatprep.subr.bf16.mxu0 %v2851_v23 }
  0x45   :  { %838 = vmatpush1.bf16.msra.mxu1 %v2891_v25  ;;  %855 = vmatprep.mubr.bf16.mxu1 %v3114_v29 }
  0x46   :  { %2642 = vmatprep.subr.bf16.mxu1 %v2897_v61  ;;  %v2924_v61 = vld [vmem:[%s4058_s7 + $0x20] sm:$0xff]  }
  0x47   :  { %785 = vmatpush1.bf16.msra.mxu0 %v2849_v26  ;;  %v3554_v26 = vsub.s32 0, %v3304_v43 }
  0x48   :  { %786 = vmatprep.subr.bf16.mxu0 %v2854_v28  ;;  %v3560_v28 = vsub.s32 1, %v3304_v43 }
  0x4b   :  { %787 = vmatpush1.bf16.msra.mxu0 %v2852_v30  ;;  %v199_v30 = vrot.slane %v194_v27, %v3554_v26 }
  0x4c   :  { %788 = vmatprep.subr.bf16.mxu0 %v2857_v32  ;;  %2478 = vmatmul.mubr.msk.bf16.vlgmr.msra.gmra.mxu1 %vm696_vm0, %v95_v31  ;;  %v203_v31 = vrot.slane %v194_v27, %v3560_v28 }
  0x4d   :  { %2643 = vmatpush3.bf16.msra.mxu1 %v2898_v62  ;;  %v2925_v62 = vld [vmem:[%s4058_s7 + $0x18] sm:$0xff]  }
  0x4e   :  { %2644 = vmatprep.subr.bf16.mxu1 %v2899_v63  ;;  %v2926_v63 = vld [vmem:[%s4058_s7 + $0x10] sm:$0xff]  }
  0x4f   :  { %789 = vmatpush1.bf16.msra.mxu0 %v2855_v33 }
  0x50   :  { %790 = vmatprep.subr.bf16.mxu0 %v2860_v34 }
  0x51   :  { %2645 = vmatpush3.bf16.msra.mxu1 %v2900_v0  ;;  %v2927_v0 = vld [vmem:[%s4058_s7 + $0x8] sm:$0xff]  }
  0x52   :  { %2646 = vmatprep.subr.bf16.mxu1 %v2901_v1 }
  0x53   :  { %791 = vmatpush1.bf16.msra.mxu0 %v2858_v35 }
  0x54   :  { %792 = vmatprep.subr.bf16.mxu0 %v2863_v36 }
  0x55   :  { %2647 = vmatpush3.bf16.msra.mxu1 %v2902_v2  ;;  %v2479_v2 = vld [vmem:[%s4059_s4] ss:$0 sm:$0xff] }
  0x56   :  { %2648 = vmatprep.subr.bf16.mxu1 %v2903_v3 }
  0x57   :  { %793 = vmatpush1.bf16.msra.mxu0 %v2861_v37 }
  0x58   :  { %794 = vmatprep.subr.bf16.mxu0 %v2866_v38 }
  0x59   :  { %2649 = vmatpush3.bf16.msra.mxu1 %v2904_v4 }
  0x5a   :  { %2650 = vmatprep.subr.bf16.mxu1 %v2905_v5 }
  0x5b   :  { %795 = vmatpush1.bf16.msra.mxu0 %v2864_v39 }
  0x5c   :  { %796 = vmatprep.subr.bf16.mxu0 %v2869_v40 }
  0x5d   :  { %2651 = vmatpush3.bf16.msra.mxu1 %v2906_v6 }
  0x5e   :  { %2652 = vmatprep.subr.bf16.mxu1 %v2907_v7 }
  0x5f   :  { %797 = vmatpush1.bf16.msra.mxu0 %v2867_v41 }
  0x60   :  { %798 = vmatprep.subr.bf16.mxu0 %v2872_v42 }
  0x61   :  { %2653 = vmatpush3.bf16.msra.mxu1 %v2908_v8 }
  0x62   :  { %2654 = vmatprep.subr.bf16.mxu1 %v2909_v9 }
  0x63   :  { %799 = vmatpush2.bf16.msra.mxu0 %v2870_v44 }
  0x64   :  { %800 = vmatprep.subr.bf16.mxu0 %v2875_v45 }
  0x65   :  { %2655 = vmatpush3.bf16.msra.mxu1 %v2910_v10  ;;  %v2928_v10 = vld [vmem:[%s4058_s7] sm:$0xff]  }
  0x66   :  { %2656 = vmatprep.subr.bf16.mxu1 %v2911_v11  ;;  %v2929_v11 = vld [vmem:[%s4060_s9 + $0x70] ss:$8 sps:$4 sm:$0xff]  }
  0x67   :  { %801 = vmatpush2.bf16.msra.mxu0 %v2873_v46 }
  0x68   :  { %802 = vmatprep.subr.bf16.mxu0 %v2878_v47 }
  0x69   :  { %2657 = vmatpush3.bf16.msra.mxu1 %v2912_v12  ;;  %v2931_v12 = vld [vmem:[%s4060_s9 + $0x74] ss:$8 sps:$4 sm:$0xff]  }
  0x6a   :  { %2704 = vmatprep.subr.bf16.mxu1 %v3115_v13 }
  0x6b   :  { %803 = vmatpush2.bf16.msra.mxu0 %v2876_v49  ;;  %v2913_v49 = vld [vmem:[%s4056_s5 + $0x38] sm:$0xff]  }
  0x6c   :  { %804 = vmatprep.subr.bf16.mxu0 %v2881_v50 }
  0x6f   :  { %805 = vmatpush2.bf16.msra.mxu0 %v2879_v51  ;;  %v2914_v51 = vld [vmem:[%s4056_s5 + $0x30] sm:$0xff]  }
  0x70   :  { %806 = vmatprep.subr.bf16.mxu0 %v2884_v52  ;;  %v2915_v52 = vld [vmem:[%s4056_s5 + $0x28] sm:$0xff]  }
  0x73   :  { %807 = vmatpush2.bf16.msra.mxu0 %v2882_v53  ;;  %v2916_v53 = vld [vmem:[%s4056_s5 + $0x20] sm:$0xff]  }
  0x74   :  { %808 = vmatprep.subr.bf16.mxu0 %v2887_v54  ;;  %v2917_v54 = vld [vmem:[%s4056_s5 + $0x18] sm:$0xff]  }
  0x77   :  { %809 = vmatpush2.bf16.msra.mxu0 %v2885_v55  ;;  %v2918_v55 = vld [vmem:[%s4056_s5 + $0x10] sm:$0xff]  }
  0x78   :  { %810 = vmatprep.subr.bf16.mxu0 %v2890_v56  ;;  %v2919_v56 = vld [vmem:[%s4056_s5 + $0x8] sm:$0xff]  }
  0x7b   :  { %811 = vmatpush2.bf16.msra.mxu0 %v2888_v57  ;;  %v2920_v57 = vld [vmem:[%s4056_s5] sm:$0xff]  }
  0x7c   :  { %812 = vmatprep.subr.bf16.mxu0 %v2896_v58  ;;  %v2921_v58 = vld [vmem:[%s4058_s7 + $0x38] sm:$0xff]  }
  0x7f   :  { %813 = vmatpush2.bf16.msra.mxu0 %v2894_v59  ;;  %v2922_v59 = vld [vmem:[%s4058_s7 + $0x30] sm:$0xff]  }
  0x80   :  { %2724 = vmatprep.subr.bf16.mxu0 %v3115_v13 }
  0x82   :  { %815 = vmatmul.mubr.bf16.vlgmr.msra.gmra.mxu0 %v93_v60  ;;  %v2923_v60 = vld [vmem:[%s4058_s7 + $0x28] sm:$0xff]  }
  0x83   :  { %2740 = vmatprep.mubr.msk.bf16.mxu0 %vm3116_vm1, %v3115_v13  ;;  %2725 = vmatpush3.bf16.msra.mxu0 %v2921_v58  ;;  %v3007_v58 = vld [vmem:[%s4062_s11 + $0x310] ss:$28 sps:$4 sm:$0xff]  }
  0x84   :  { %2726 = vmatprep.subr.bf16.mxu0 %v3115_v13 }
  0x87   :  { %2727 = vmatpush3.bf16.msra.mxu0 %v2922_v59  ;;  %v3015_v59 = vld [vmem:[%s4062_s11 + $0x2dc] ss:$28 sps:$4 sm:$0xff]  }
  0x88   :  { %2728 = vmatprep.subr.bf16.mxu0 %v3115_v13 }
  0x8b   :  { %2729 = vmatpush3.bf16.msra.mxu0 %v2923_v60  ;;  %v3013_v60 = vld [vmem:[%s4062_s11 + $0x2d8] ss:$28 sps:$4 sm:$0xff]  }
  0x8c   :  { %2730 = vmatprep.subr.bf16.mxu0 %v3115_v13 }
  0x8f   :  { %2731 = vmatpush3.bf16.msra.mxu0 %v2924_v61  ;;  %v3021_v61 = vld [vmem:[%s4062_s11 + $0x2a4] ss:$28 sps:$4 sm:$0xff]  }
  0x90   :  { %2732 = vmatprep.subr.bf16.mxu0 %v3115_v13 }
  0x93   :  { %2733 = vmatpush3.bf16.msra.mxu0 %v2925_v62  ;;  %v3019_v62 = vld [vmem:[%s4062_s11 + $0x2a0] ss:$28 sps:$4 sm:$0xff]  }
  0x94   :  { %2734 = vmatprep.subr.bf16.mxu0 %v3115_v13 }
  0x97   :  { %2735 = vmatpush3.bf16.msra.mxu0 %v2926_v63  ;;  %v3027_v63 = vld [vmem:[%s4062_s11 + $0x26c] ss:$28 sps:$4 sm:$0xff]  }
  0x98   :  { %2736 = vmatprep.subr.bf16.mxu0 %v3115_v13 }
  0x9b   :  { %2737 = vmatpush3.bf16.msra.mxu0 %v2927_v0  ;;  %v3025_v0 = vld [vmem:[%s4062_s11 + $0x268] ss:$28 sps:$4 sm:$0xff]  }
  0x9c   :  { %2738 = vmatprep.subr.bf16.mxu0 %v3115_v13 }
  0x9f   :  { %2739 = vmatpush3.bf16.msra.mxu0 %v2928_v10 }
 0x102   :  { %v734_v14 = vpop.f32.mrf.mxu0 }
 0x103   :  { %v735_v32 = vadd.f32 %v734_v14, %v199_v30  ;;  %v2937_v14 = vld [vmem:[%s4060_s9 + $0x54] ss:$8 sps:$4 sm:$0xff]  }
 0x104   :  { %v736_v15 = vpop.f32.mrf.mxu0  ;;  %v775_v16 = vpop.f32.mrf.mxu1 }
 0x105   :  { %v737_v33 = vadd.f32 %v736_v15, %v203_v31  ;;  %v776_v34 = vadd.f32 %v775_v16, %v735_v32  ;;  %v2935_v15 = vld [vmem:[%s4060_s9 + $0x50] ss:$8 sps:$4 sm:$0xff]   ;;  %v2940_v16 = vld [vmem:[%s4060_s9 + $0x44] ss:$8 sps:$4 sm:$0xff]  }
 0x106   :  { %v738_v17 = vpop.f32.mrf.mxu0  ;;  %v777_v18 = vpop.f32.mrf.mxu1 }
 0x107   :  { %v778_v36 = vadd.f32 %v777_v18, %v737_v33  ;;  %v2938_v17 = vld [vmem:[%s4060_s9 + $0x40] ss:$8 sps:$4 sm:$0xff]   ;;  %v2943_v18 = vld [vmem:[%s4060_s9 + $0x34] ss:$8 sps:$4 sm:$0xff]  }
 0x108   :  { %v739_v19 = vpop.f32.mrf.mxu0  ;;  %v779_v20 = vpop.f32.mrf.mxu1 }
 0x109   :  { %v2941_v19 = vld [vmem:[%s4060_s9 + $0x30] ss:$8 sps:$4 sm:$0xff]   ;;  %v2946_v20 = vld [vmem:[%s4060_s9 + $0x24] ss:$8 sps:$4 sm:$0xff]  }
 0x10a   :  { %v780_v21 = vpop.f32.mrf.mxu1 }
 0x10b   :  { %v2944_v21 = vld [vmem:[%s4060_s9 + $0x20] ss:$8 sps:$4 sm:$0xff]  }
 0x10c   :  { %v857_v22 = vpop.f32.mrf.mxu1 }
 0x10e   :  { %v859_v23 = vpop.f32.mrf.mxu1 }
 0x110   :  { %v861_v24 = vpop.f32.mrf.mxu1 }
 0x111   :  { %v2496_v24 = vld [vmem:[%s4061_s6] ss:$0 sm:$0xff] }
 0x112   :  { %v862_v25 = vpop.f32.mrf.mxu1 }
 0x142   :  { %v816_v35 = vpop.f32.mrf.mxu0 }
 0x143   :  { %v817_v37 = vadd.f32 %v816_v35, %v776_v34  ;;  %v2952_v34 = vld [vmem:[%s4060_s9 + $0x4] ss:$8 sps:$4 sm:$0xff]   ;;  %v2950_v35 = vld [vmem:[%s4060_s9] ss:$8 sps:$4 sm:$0xff]  }
 0x144   :  { %v818_v38 = vpop.f32.mrf.mxu0 }
 0x145   :  { %v858_v39 = vadd.f32 %v857_v22, %v817_v37  ;;  %v819_v40 = vadd.f32 %v818_v38, %v778_v36  ;;  %v2949_v22 = vld [vmem:[%s4060_s9 + $0x14] ss:$8 sps:$4 sm:$0xff]   ;;  %v2953_v36 = vld [vmem:[%s4062_s11 + $0x188] ss:$28 sps:$4 sm:$0xff]  }
 0x146   :  { %v820_v41 = vpop.f32.mrf.mxu0  ;;  %v2955_v37 = vld [vmem:[%s4062_s11 + $0x18c] ss:$28 sps:$4 sm:$0xff]   ;;  %v2958_v38 = vld [vmem:[%s4062_s11 + $0x194] ss:$28 sps:$4 sm:$0xff]  }
 0x147   :  { %v860_v42 = vadd.f32 %v859_v23, %v819_v40  ;;  %v864_v44 = vmax.f32 %v858_v39, 0.0  ;;  %v2947_v23 = vld [vmem:[%s4060_s9 + $0x10] ss:$8 sps:$4 sm:$0xff]   ;;  %2164 = vmatprep.subr.bf16.mxu0 %v2955_v37 }
 0x148   :  { %v821_v45 = vpop.f32.mrf.mxu0  ;;  %v2961_v39 = vld [vmem:[%s4062_s11 + $0x154] ss:$28 sps:$4 sm:$0xff]   ;;  %v2967_v41 = vld [vmem:[%s4062_s11 + $0x11c] ss:$28 sps:$4 sm:$0xff]  }
 0x149   :  { %v865_v46 = vmax.f32 %v860_v42, 0.0  ;;  %v866_v50 = vpack.c.bf16 %v864_v44, %v864_v44  ;;  %v2959_v40 = vld [vmem:[%s4062_s11 + $0x150] ss:$28 sps:$4 sm:$0xff]   ;;  %v2965_v42 = vld [vmem:[%s4062_s11 + $0x118] ss:$28 sps:$4 sm:$0xff]  }
 0x14a   :  { %v2973_v44 = vld [vmem:[%s4062_s11 + $0xe4] ss:$28 sps:$4 sm:$0xff]   ;;  %v3028_v37 = vld [vmem:[%s4062_s11 + $0x270] ss:$28 sps:$4 sm:$0xff]  }
 0x14b   :  { %v867_v47 = vpack.c.bf16 %v865_v46, %v865_v46  ;;  %v2971_v45 = vld [vmem:[%s4062_s11 + $0xe0] ss:$28 sps:$4 sm:$0xff]   ;;  %v2979_v46 = vld [vmem:[%s4062_s11 + $0xac] ss:$28 sps:$4 sm:$0xff]  }
 0x14d   :  { %1035 = vmatprep.mubr.bf16.mxu1 %v867_v47  ;;  %v2977_v47 = vld [vmem:[%s4062_s11 + $0xa8] ss:$28 sps:$4 sm:$0xff]  }
 0x14e   :  { %1036 = vmatmul.mubr.bf16.vlgmr.msra.gmra.mxu1 %v866_v50  ;;  %v2983_v50 = vld [vmem:[%s4062_s11 + $0x70] ss:$28 sps:$4 sm:$0xff]  }
 0x14f   :  { %2705 = vmatpush3.bf16.msra.mxu1 %v2913_v49  ;;  %2720 = vmatprep.mubr.msk.bf16.mxu1 %vm3116_vm1, %v3115_v13  ;;  %v2985_v49 = vld [vmem:[%s4062_s11 + $0x74] ss:$28 sps:$4 sm:$0xff]  }
 0x150   :  { %2706 = vmatprep.subr.bf16.mxu1 %v3115_v13 }
 0x153   :  { %2707 = vmatpush3.bf16.msra.mxu1 %v2914_v51  ;;  %v2991_v51 = vld [vmem:[%s4062_s11 + $0x3c] ss:$28 sps:$4 sm:$0xff]  }
 0x154   :  { %2708 = vmatprep.subr.bf16.mxu1 %v3115_v13 }
 0x157   :  { %2709 = vmatpush3.bf16.msra.mxu1 %v2915_v52  ;;  %v2989_v52 = vld [vmem:[%s4062_s11 + $0x38] ss:$28 sps:$4 sm:$0xff]  }
 0x158   :  { %2710 = vmatprep.subr.bf16.mxu1 %v3115_v13 }
 0x15b   :  { %2711 = vmatpush3.bf16.msra.mxu1 %v2916_v53  ;;  %v2997_v53 = vld [vmem:[%s4062_s11 + $0x4] ss:$28 sps:$4 sm:$0xff]  }
 0x15c   :  { %2712 = vmatprep.subr.bf16.mxu1 %v3115_v13 }
 0x15f   :  { %2713 = vmatpush3.bf16.msra.mxu1 %v2917_v54  ;;  %v2995_v54 = vld [vmem:[%s4062_s11] ss:$28 sps:$4 sm:$0xff]  }
 0x160   :  { %2714 = vmatprep.subr.bf16.mxu1 %v3115_v13 }
 0x163   :  { %2715 = vmatpush3.bf16.msra.mxu1 %v2918_v55  ;;  %v3003_v55 = vld [vmem:[%s4062_s11 + $0x34c] ss:$28 sps:$4 sm:$0xff]  }
 0x164   :  { %2716 = vmatprep.subr.bf16.mxu1 %v3115_v13 }
 0x167   :  { %2717 = vmatpush3.bf16.msra.mxu1 %v2919_v56  ;;  %v3001_v56 = vld [vmem:[%s4062_s11 + $0x348] ss:$28 sps:$4 sm:$0xff]  }
 0x168   :  { %2718 = vmatprep.subr.bf16.mxu1 %v3115_v13  ;;  %v2934_v13 = vld [vmem:[%s4060_s9 + $0x64] ss:$8 sps:$4 sm:$0xff]  }
 0x16b   :  { %2719 = vmatpush3.bf16.msra.mxu1 %v2920_v57  ;;  %v3009_v57 = vld [vmem:[%s4062_s11 + $0x314] ss:$28 sps:$4 sm:$0xff]  }
 0x16c   :  { %1378 = vmatprep.subr.bf16.mxu1 %v2931_v12 }
 0x20e   :  { %v2658_v1 = vpop.f32.mrf.mxu1 }
 0x210   :  { %v2659_v3 = vpop.f32.mrf.mxu1 }
 0x211   :  { %v2660_v4 = vadd.f32 %v2659_v3, %v2658_v1  ;;  %v3033_v1 = vld [vmem:[%s4062_s11 + $0x234] ss:$28 sps:$4 sm:$0xff]   ;;  %v2505_v3 = vld [vmem:[%s4063_s8] ss:$0 sm:$0xff] }
 0x212   :  { %v2661_v5 = vpop.f32.mrf.mxu1 }
 0x213   :  { %v1038_v6 = vadd.f32 %v2660_v4, %v2479_v2  ;;  %v3031_v2 = vld [vmem:[%s4062_s11 + $0x230] ss:$28 sps:$4 sm:$0xff]  }
 0x214   :  { %v2662_v7 = vpop.f32.mrf.mxu1 }
 0x215   :  { %v1043_v8 = vmax.f32 %v1038_v6, 0.0 }
 0x217   :  { %v1044_v9 = vpack.c.bf16 %v1043_v8, %v1043_v8 }
 0x219   :  { %2721 = vmatmul.mubr.bf16.vlgmr.msra.gmra.mxu1 %v1044_v9  ;;  %v2956_v9 = vld [vmem:[%s4062_s11 + $0x190] ss:$28 sps:$4 sm:$0xff]  }
 0x21a   :  { %1410 = vmatprep.mubr.bf16.mxu1 %v3114_v29  ;;  %1379 = vmatpush1.bf16.msra.mxu1 %v2929_v11  ;;  %v2932_v29 = vld [vmem:[%s4060_s9 + $0x60] ss:$8 sps:$4 sm:$0xff]   ;;  %v2964_v11 = vld [vmem:[%s4062_s11 + $0x15c] ss:$28 sps:$4 sm:$0xff]  }
 0x21b   :  { %1380 = vmatprep.subr.bf16.mxu1 %v2934_v13  ;;  %v2962_v13 = vld [vmem:[%s4062_s11 + $0x158] ss:$28 sps:$4 sm:$0xff]  }
 0x21e   :  { %1381 = vmatpush1.bf16.msra.mxu1 %v2932_v29  ;;  %v2970_v29 = vld [vmem:[%s4062_s11 + $0x124] ss:$28 sps:$4 sm:$0xff]  }
 0x21f   :  { %1382 = vmatprep.subr.bf16.mxu1 %v2937_v14  ;;  %v2968_v14 = vld [vmem:[%s4062_s11 + $0x120] ss:$28 sps:$4 sm:$0xff]  }
 0x222   :  { %1383 = vmatpush1.bf16.msra.mxu1 %v2935_v15  ;;  %v2976_v15 = vld [vmem:[%s4062_s11 + $0xec] ss:$28 sps:$4 sm:$0xff]  }
 0x223   :  { %1384 = vmatprep.subr.bf16.mxu1 %v2940_v16  ;;  %v2974_v16 = vld [vmem:[%s4062_s11 + $0xe8] ss:$28 sps:$4 sm:$0xff]  }
 0x226   :  { %1385 = vmatpush1.bf16.msra.mxu1 %v2938_v17  ;;  %v2982_v17 = vld [vmem:[%s4062_s11 + $0xb4] ss:$28 sps:$4 sm:$0xff]  }
 0x227   :  { %1386 = vmatprep.subr.bf16.mxu1 %v2943_v18  ;;  %v2980_v18 = vld [vmem:[%s4062_s11 + $0xb0] ss:$28 sps:$4 sm:$0xff]  }
 0x22a   :  { %1387 = vmatpush1.bf16.msra.mxu1 %v2941_v19  ;;  %v2988_v19 = vld [vmem:[%s4062_s11 + $0x7c] ss:$28 sps:$4 sm:$0xff]  }
 0x22b   :  { %1388 = vmatprep.subr.bf16.mxu1 %v2946_v20  ;;  %v2986_v20 = vld [vmem:[%s4062_s11 + $0x78] ss:$28 sps:$4 sm:$0xff]  }
 0x22e   :  { %1389 = vmatpush1.bf16.msra.mxu1 %v2944_v21  ;;  %v2994_v21 = vld [vmem:[%s4062_s11 + $0x44] ss:$28 sps:$4 sm:$0xff]  }
 0x22f   :  { %1390 = vmatprep.subr.bf16.mxu1 %v2949_v22  ;;  %v2992_v22 = vld [vmem:[%s4062_s11 + $0x40] ss:$28 sps:$4 sm:$0xff]  }
 0x232   :  { %1391 = vmatpush1.bf16.msra.mxu1 %v2947_v23  ;;  %v3000_v23 = vld [vmem:[%s4062_s11 + $0xc] ss:$28 sps:$4 sm:$0xff]  }
 0x233   :  { %1392 = vmatprep.subr.bf16.mxu1 %v2952_v34  ;;  %v3024_v34 = vld [vmem:[%s4062_s11 + $0x2ac] ss:$28 sps:$4 sm:$0xff]  }
 0x236   :  { %1393 = vmatpush1.bf16.msra.mxu1 %v2950_v35  ;;  %v3022_v35 = vld [vmem:[%s4062_s11 + $0x2a8] ss:$28 sps:$4 sm:$0xff]  }
 0x237   :  { %2205 = vmatprep.subr.bf16.mxu1 %v2958_v38  ;;  %v3036_v38 = vld [vmem:[%s4062_s11 + $0x23c] ss:$28 sps:$4 sm:$0xff]  }
 0x2d9   :  { %v1150_v25 = vpop.f32.mrf.mxu1 }
 0x2da   :  { %v1151_v27 = vadd.f32 %v2496_v24, %v1150_v25  ;;  %v2998_v24 = vld [vmem:[%s4062_s11 + $0x8] ss:$28 sps:$4 sm:$0xff]   ;;  %v3006_v25 = vld [vmem:[%s4062_s11 + $0x354] ss:$28 sps:$4 sm:$0xff]  }
 0x2db   :  { %v2722_v30 = vpop.f32.mrf.mxu1 }
 0x2dc   :  { %v1156_v31 = vpack.c.bf16 %v1151_v27, %v1151_v27  ;;  %v3004_v27 = vld [vmem:[%s4062_s11 + $0x350] ss:$28 sps:$4 sm:$0xff]   ;;  %v3012_v30 = vld [vmem:[%s4062_s11 + $0x31c] ss:$28 sps:$4 sm:$0xff]  }
 0x2dd   :  { %v1153_v32 = vpop.f32.mrf.mxu1 }
 0x2de   :  { %2741 = vmatmul.mubr.bf16.vlgmr.msra.gmra.mxu0 %v1156_v31  ;;  %v3010_v31 = vld [vmem:[%s4062_s11 + $0x318] ss:$28 sps:$4 sm:$0xff]   ;;  %v3018_v32 = vld [vmem:[%s4062_s11 + $0x2e4] ss:$28 sps:$4 sm:$0xff]  }
 0x2df   :  { %v2723_v33 = vpop.f32.mrf.mxu1  ;;  %2165 = vmatpush1.bf16.msra.mxu0 %v2953_v36  ;;  %v3030_v36 = vld [vmem:[%s4062_s11 + $0x274] ss:$28 sps:$4 sm:$0xff]  }
 0x2e0   :  { %2166 = vmatprep.subr.bf16.mxu0 %v2961_v39  ;;  %v3016_v33 = vld [vmem:[%s4062_s11 + $0x2e0] ss:$28 sps:$4 sm:$0xff]   ;;  %v3034_v39 = vld [vmem:[%s4062_s11 + $0x238] ss:$28 sps:$4 sm:$0xff]  }
 0x2e3   :  { %2167 = vmatpush1.bf16.msra.mxu0 %v2959_v40  ;;  %v3039_v40 = vld [vmem:[%s4062_s11 + $0x1fc] ss:$28 sps:$4 sm:$0xff]  }
 0x2e4   :  { %2168 = vmatprep.subr.bf16.mxu0 %v2967_v41  ;;  %v3042_v41 = vld [vmem:[%s4062_s11 + $0x204] ss:$28 sps:$4 sm:$0xff]  }
 0x2e7   :  { %2169 = vmatpush1.bf16.msra.mxu0 %v2965_v42  ;;  %v3037_v42 = vld [vmem:[%s4062_s11 + $0x1f8] ss:$28 sps:$4 sm:$0xff]  }
 0x2e8   :  { %2170 = vmatprep.subr.bf16.mxu0 %v2973_v44  ;;  %v3040_v44 = vld [vmem:[%s4062_s11 + $0x200] ss:$28 sps:$4 sm:$0xff]  }
 0x2eb   :  { %2171 = vmatpush1.bf16.msra.mxu0 %v2971_v45  ;;  %v3045_v45 = vld [vmem:[%s4062_s11 + $0x1c4] ss:$28 sps:$4 sm:$0xff]  }
 0x2ec   :  { %2172 = vmatprep.subr.bf16.mxu0 %v2979_v46  ;;  %v3048_v46 = vld [vmem:[%s4062_s11 + $0x1cc] ss:$28 sps:$4 sm:$0xff]  }
 0x2ef   :  { %2173 = vmatpush1.bf16.msra.mxu0 %v2977_v47  ;;  %v3043_v47 = vld [vmem:[%s4062_s11 + $0x1c0] ss:$28 sps:$4 sm:$0xff]  }
 0x2f0   :  { %2174 = vmatprep.subr.bf16.mxu0 %v2985_v49  ;;  %v3046_v49 = vld [vmem:[%s4062_s11 + $0x1c8] ss:$28 sps:$4 sm:$0xff]  }
 0x2f3   :  { %2175 = vmatpush1.bf16.msra.mxu0 %v2983_v50  ;;  %v3051_v50 = vld [vmem:[%s4062_s11 + $0x19c] ss:$28 sps:$4 sm:$0xff]  }
 0x2f4   :  { %2176 = vmatprep.subr.bf16.mxu0 %v2991_v51  ;;  %v3052_v51 = vld [vmem:[%s4062_s11 + $0x360] ss:$28 sps:$4 sm:$0xff]  }
 0x2f7   :  { %2177 = vmatpush1.bf16.msra.mxu0 %v2989_v52  ;;  %v1286_v52 = vld [vmem:[%s4064_s10] sm:$0x3] }
 0x2f8   :  { %2178 = vmatprep.subr.bf16.mxu0 %v2997_v53  ;;  %v1291_v53 = vrot.slane %v1286_v52, %v3554_v26 }
 0x2fb   :  { %2179 = vmatpush1.bf16.msra.mxu0 %v2995_v54  ;;  %v1295_v54 = vrot.slane %v1286_v52, %v3560_v28  ;;  %v1567_v52 = vsub.s32 3, %v3304_v43 }
 0x2fc   :  { %2180 = vmatprep.subr.bf16.mxu0 %v3003_v55 }
 0x2ff   :  { %2181 = vmatpush2.bf16.msra.mxu0 %v3001_v56 }
 0x300   :  { %2182 = vmatprep.subr.bf16.mxu0 %v3009_v57 }
 0x303   :  { %2183 = vmatpush2.bf16.msra.mxu0 %v3007_v58 }
 0x304   :  { %2184 = vmatprep.subr.bf16.mxu0 %v3015_v59 }
 0x307   :  { %2185 = vmatpush2.bf16.msra.mxu0 %v3013_v60 }
 0x308   :  { %2186 = vmatprep.subr.bf16.mxu0 %v3021_v61 }
 0x30b   :  { %2187 = vmatpush2.bf16.msra.mxu0 %v3019_v62 }
 0x30c   :  { %2188 = vmatprep.subr.bf16.mxu0 %v3027_v63 }
 0x30f   :  { %2189 = vmatpush2.bf16.msra.mxu0 %v3025_v0  ;;  %v3049_v0 = vld [vmem:[%s4062_s11 + $0x198] ss:$28 sps:$4 sm:$0xff]  }
 0x310   :  { %2190 = vmatprep.subr.bf16.mxu0 %v3033_v1  ;;  %v3053_v1 = vld [vmem:[%s4062_s11 + $0x1a0] ss:$28 sps:$4 sm:$0xff]  }
 0x313   :  { %2191 = vmatpush2.bf16.msra.mxu0 %v3031_v2 }
 0x314   :  { %2192 = vmatprep.subr.bf16.mxu0 %v3039_v40  ;;  %v3098_v40 = vld [vmem:[%s4062_s11 + $0x2b0] ss:$28 sps:$4 sm:$0xff]  }
 0x317   :  { %2193 = vmatpush2.bf16.msra.mxu0 %v3037_v42  ;;  %v3101_v42 = vld [vmem:[%s4062_s11 + $0x278] ss:$28 sps:$4 sm:$0xff]  }
 0x318   :  { %2194 = vmatprep.subr.bf16.mxu0 %v3045_v45  ;;  %v3104_v45 = vld [vmem:[%s4062_s11 + $0x240] ss:$28 sps:$4 sm:$0xff]  }
 0x31b   :  { %2195 = vmatpush2.bf16.msra.mxu0 %v3043_v47  ;;  %v3107_v47 = vld [vmem:[%s4062_s11 + $0x208] ss:$28 sps:$4 sm:$0xff]  }
 0x31c   :  { %2246 = vmatprep.subr.bf16.mxu0 %v3051_v50  ;;  %v3110_v50 = vld [vmem:[%s4062_s11 + $0x1d0] ss:$28 sps:$4 sm:$0xff]  }
 0x39e   :  { %v1262_v4 = vpop.f32.mrf.mxu0 }
 0x39f   :  { %v1263_v5 = vadd.f32 %v2505_v3, %v1262_v4  ;;  %v3056_v3 = vld [vmem:[%s4062_s11 + $0x164] ss:$28 sps:$4 sm:$0xff]  }
 0x3a0   :  { %v2742_v6 = vpop.f32.mrf.mxu0  ;;  %v3057_v4 = vld [vmem:[%s4062_s11 + $0x328] ss:$28 sps:$4 sm:$0xff]  }
 0x3a1   :  { %v1268_v7 = vmax.f32 %v1263_v5, 0.0  ;;  %v3054_v5 = vld [vmem:[%s4062_s11 + $0x160] ss:$28 sps:$4 sm:$0xff]   ;;  %v3058_v6 = vld [vmem:[%s4062_s11 + $0x168] ss:$28 sps:$4 sm:$0xff]  }
 0x3a2   :  { %v1265_v8 = vpop.f32.mrf.mxu0 }
 0x3a3   :  { %v1269_v10 = vpack.c.bf16 %v1268_v7, %v1268_v7  ;;  %v3061_v7 = vld [vmem:[%s4062_s11 + $0x12c] ss:$28 sps:$4 sm:$0xff]  }
 0x3a4   :  { %v2743_v12 = vpop.f32.mrf.mxu0  ;;  %v3062_v8 = vld [vmem:[%s4062_s11 + $0x2f0] ss:$28 sps:$4 sm:$0xff]  }
 0x3a5   :  { %1411 = vmatmul.mubr.bf16.vlgmr.msra.gmra.mxu1 %v1269_v10  ;;  %v3063_v10 = vld [vmem:[%s4062_s11 + $0x130] ss:$28 sps:$4 sm:$0xff]   ;;  %v3067_v12 = vld [vmem:[%s4062_s11 + $0x2b8] ss:$28 sps:$4 sm:$0xff]  }
 0x3a6   :  { %2206 = vmatpush1.bf16.msra.mxu1 %v2956_v9  ;;  %v3059_v9 = vld [vmem:[%s4062_s11 + $0x128] ss:$28 sps:$4 sm:$0xff]  }
 0x3a7   :  { %2207 = vmatprep.subr.bf16.mxu1 %v2964_v11  ;;  %v3066_v11 = vld [vmem:[%s4062_s11 + $0xf4] ss:$28 sps:$4 sm:$0xff]  }
 0x3aa   :  { %2208 = vmatpush1.bf16.msra.mxu1 %v2962_v13  ;;  %v3064_v13 = vld [vmem:[%s4062_s11 + $0xf0] ss:$28 sps:$4 sm:$0xff]  }
 0x3ab   :  { %2209 = vmatprep.subr.bf16.mxu1 %v2970_v29  ;;  %v3068_v29 = vld [vmem:[%s4062_s11 + $0xf8] ss:$28 sps:$4 sm:$0xff]  }
 0x3ae   :  { %2210 = vmatpush1.bf16.msra.mxu1 %v2968_v14  ;;  %v3071_v14 = vld [vmem:[%s4062_s11 + $0xbc] ss:$28 sps:$4 sm:$0xff]  }
 0x3af   :  { %2211 = vmatprep.subr.bf16.mxu1 %v2976_v15  ;;  %v3072_v15 = vld [vmem:[%s4062_s11 + $0x280] ss:$28 sps:$4 sm:$0xff]  }
 0x3b2   :  { %2212 = vmatpush1.bf16.msra.mxu1 %v2974_v16  ;;  %v3069_v16 = vld [vmem:[%s4062_s11 + $0xb8] ss:$28 sps:$4 sm:$0xff]  }
 0x3b3   :  { %2213 = vmatprep.subr.bf16.mxu1 %v2982_v17  ;;  %v3073_v17 = vld [vmem:[%s4062_s11 + $0xc0] ss:$28 sps:$4 sm:$0xff]  }
 0x3b6   :  { %2214 = vmatpush1.bf16.msra.mxu1 %v2980_v18  ;;  %v3076_v18 = vld [vmem:[%s4062_s11 + $0x84] ss:$28 sps:$4 sm:$0xff]  }
 0x3b7   :  { %2215 = vmatprep.subr.bf16.mxu1 %v2988_v19  ;;  %v3077_v19 = vld [vmem:[%s4062_s11 + $0x248] ss:$28 sps:$4 sm:$0xff]  }
 0x3ba   :  { %2216 = vmatpush1.bf16.msra.mxu1 %v2986_v20  ;;  %v3074_v20 = vld [vmem:[%s4062_s11 + $0x80] ss:$28 sps:$4 sm:$0xff]  }
 0x3bb   :  { %2217 = vmatprep.subr.bf16.mxu1 %v2994_v21  ;;  %v3078_v21 = vld [vmem:[%s4062_s11 + $0x88] ss:$28 sps:$4 sm:$0xff]  }
 0x3be   :  { %2218 = vmatpush1.bf16.msra.mxu1 %v2992_v22  ;;  %v3081_v22 = vld [vmem:[%s4062_s11 + $0x4c] ss:$28 sps:$4 sm:$0xff]  }
 0x3bf   :  { %2219 = vmatprep.subr.bf16.mxu1 %v3000_v23  ;;  %v3082_v23 = vld [vmem:[%s4062_s11 + $0x210] ss:$28 sps:$4 sm:$0xff]  }
 0x3c2   :  { %2220 = vmatpush1.bf16.msra.mxu1 %v2998_v24  ;;  %v3079_v24 = vld [vmem:[%s4062_s11 + $0x48] ss:$28 sps:$4 sm:$0xff]  }
 0x3c3   :  { %2221 = vmatprep.subr.bf16.mxu1 %v3006_v25  ;;  %v3083_v25 = vld [vmem:[%s4062_s11 + $0x50] ss:$28 sps:$4 sm:$0xff]  }
 0x3c6   :  { %2222 = vmatpush2.bf16.msra.mxu1 %v3004_v27  ;;  %v3086_v27 = vld [vmem:[%s4062_s11 + $0x14] ss:$28 sps:$4 sm:$0xff]  }
 0x3c7   :  { %2223 = vmatprep.subr.bf16.mxu1 %v3012_v30  ;;  %v3087_v30 = vld [vmem:[%s4062_s11 + $0x1d8] ss:$28 sps:$4 sm:$0xff]  }
 0x3ca   :  { %2224 = vmatpush2.bf16.msra.mxu1 %v3010_v31  ;;  %v3084_v31 = vld [vmem:[%s4062_s11 + $0x10] ss:$28 sps:$4 sm:$0xff]  }
 0x3cb   :  { %2225 = vmatprep.subr.bf16.mxu1 %v3018_v32  ;;  %v3088_v32 = vld [vmem:[%s4062_s11 + $0x18] ss:$28 sps:$4 sm:$0xff]  }
 0x3ce   :  { %2226 = vmatpush2.bf16.msra.mxu1 %v3016_v33  ;;  %v3091_v33 = vld [vmem:[%s4062_s11 + $0x35c] ss:$28 sps:$4 sm:$0xff]  }
 0x3cf   :  { %2227 = vmatprep.subr.bf16.mxu1 %v3024_v34  ;;  %v3089_v34 = vld [vmem:[%s4062_s11 + $0x358] ss:$28 sps:$4 sm:$0xff]  }
 0x3d2   :  { %2228 = vmatpush2.bf16.msra.mxu1 %v3022_v35  ;;  %v3094_v35 = vld [vmem:[%s4062_s11 + $0x324] ss:$28 sps:$4 sm:$0xff]  }
 0x3d3   :  { %2229 = vmatprep.subr.bf16.mxu1 %v3030_v36  ;;  %v3092_v36 = vld [vmem:[%s4062_s11 + $0x320] ss:$28 sps:$4 sm:$0xff]  }
 0x3d6   :  { %2230 = vmatpush2.bf16.msra.mxu1 %v3028_v37  ;;  %v3097_v37 = vld [vmem:[%s4062_s11 + $0x2ec] ss:$28 sps:$4 sm:$0xff]  }
 0x3d7   :  { %2231 = vmatprep.subr.bf16.mxu1 %v3036_v38  ;;  %v3095_v38 = vld [vmem:[%s4062_s11 + $0x2e8] ss:$28 sps:$4 sm:$0xff]  }
 0x3da   :  { %2232 = vmatpush2.bf16.msra.mxu1 %v3034_v39  ;;  %v3100_v39 = vld [vmem:[%s4062_s11 + $0x2b4] ss:$28 sps:$4 sm:$0xff]  }
 0x3db   :  { %2233 = vmatprep.subr.bf16.mxu1 %v3042_v41  ;;  %v3103_v41 = vld [vmem:[%s4062_s11 + $0x27c] ss:$28 sps:$4 sm:$0xff]  }
 0x3de   :  { %2234 = vmatpush2.bf16.msra.mxu1 %v3040_v44  ;;  %v3106_v44 = vld [vmem:[%s4062_s11 + $0x244] ss:$28 sps:$4 sm:$0xff]  }
 0x3df   :  { %2235 = vmatprep.subr.bf16.mxu1 %v3048_v46  ;;  %v3109_v46 = vld [vmem:[%s4062_s11 + $0x20c] ss:$28 sps:$4 sm:$0xff]  }
 0x3e2   :  { %2236 = vmatpush2.bf16.msra.mxu1 %v3046_v49  ;;  %v3112_v49 = vld [vmem:[%s4062_s11 + $0x1d4] ss:$28 sps:$4 sm:$0xff]  }
 0x3e3   :  { %2682 = vmatprep.subr.bf16.mxu1 %v3052_v51  ;;  %v1563_v51 = vsub.s32 2, %v3304_v43 }
 0x465   :  { %v1412_v55 = vpop.f32.mrf.mxu1 }
 0x466   :  { %v1413_v56 = vadd.f32 %v1412_v55, %v1291_v53  ;;  %v1551_v53 = vld [vmem:[%s4065_s12] sm:$0x7f] }
 0x467   :  { %v1414_v57 = vpop.f32.mrf.mxu1  ;;  %v1564_v55 = vrot.slane %v1551_v53, %v1563_v51 }
 0x468   :  { %v1415_v58 = vadd.f32 %v1414_v57, %v1295_v54  ;;  %v1419_v59 = vmax.f32 %v1413_v56, 0.0  ;;  %v1556_v54 = vrot.slane %v1551_v53, %v3554_v26  ;;  %v1560_v56 = vrot.slane %v1551_v53, %v3560_v28 }
 0x469   :  { %v1416_v60 = vpop.f32.mrf.mxu1  ;;  %v1568_v57 = vrot.slane %v1551_v53, %v1567_v52 }
 0x46a   :  { %v1420_v61 = vmax.f32 %v1415_v58, 0.0  ;;  %v3895_v2 = vpack.c.bf16 %v1419_v59, %v1419_v59 }
 0x46b   :  { %v1417_v62 = vpop.f32.mrf.mxu1 }
 0x46c   :  { %v1422_v63 = vpack.c.bf16 %v1420_v61, %v1420_v61 }
 0x46e   :  { %2196 = vmatprep.mubr.bf16.mxu0 %v1422_v63  ;;  %2237 = vmatprep.mubr.bf16.mxu1 %v1422_v63 }
 0x46f   :  { %2197 = vmatmul.mubr.bf16.vlgmr.msra.gmra.mxu0 %v3895_v2  ;;  %2238 = vmatmul.mubr.bf16.vlgmr.msra.gmra.mxu1 %v3895_v2 }
 0x470   :  { %2247 = vmatpush1.bf16.msra.mxu0 %v3049_v0  ;;  %2683 = vmatpush3.bf16.msra.mxu1 %v3053_v1 }
 0x471   :  { %2278 = vmatprep.mubr.bf16.mxu0 %v1422_v63  ;;  %2319 = vmatprep.mubr.bf16.mxu1 %v1422_v63 }
 0x472   :  { %2248 = vmatprep.subr.bf16.mxu0 %v3056_v3  ;;  %2684 = vmatprep.subr.bf16.mxu1 %v3057_v4 }
 0x474   :  { %2249 = vmatpush1.bf16.msra.mxu0 %v3054_v5  ;;  %2685 = vmatpush3.bf16.msra.mxu1 %v3058_v6 }
 0x475   :  { %2250 = vmatprep.subr.bf16.mxu0 %v3061_v7  ;;  %2686 = vmatprep.subr.bf16.mxu1 %v3062_v8 }
 0x478   :  { %2251 = vmatpush1.bf16.msra.mxu0 %v3059_v9  ;;  %2687 = vmatpush3.bf16.msra.mxu1 %v3063_v10 }
 0x479   :  { %2252 = vmatprep.subr.bf16.mxu0 %v3066_v11  ;;  %2688 = vmatprep.subr.bf16.mxu1 %v3067_v12 }
 0x47c   :  { %2253 = vmatpush1.bf16.msra.mxu0 %v3064_v13  ;;  %2689 = vmatpush3.bf16.msra.mxu1 %v3068_v29  ;;  %v1579_v13 = vsub.s32 6, %v3304_v43  ;;  %v1571_v29 = vsub.s32 4, %v3304_v43 }
 0x47d   :  { %2254 = vmatprep.subr.bf16.mxu0 %v3071_v14  ;;  %2690 = vmatprep.subr.bf16.mxu1 %v3072_v15  ;;  %v1575_v14 = vsub.s32 5, %v3304_v43 }
 0x47e   :  { %v1580_v15 = vrot.slane %v1551_v53, %v1579_v13 }
 0x480   :  { %2255 = vmatpush1.bf16.msra.mxu0 %v3069_v16  ;;  %2691 = vmatpush3.bf16.msra.mxu1 %v3073_v17  ;;  %v1572_v17 = vrot.slane %v1551_v53, %v1571_v29 }
 0x481   :  { %2256 = vmatprep.subr.bf16.mxu0 %v3076_v18  ;;  %2692 = vmatprep.subr.bf16.mxu1 %v3077_v19  ;;  %v1576_v18 = vrot.slane %v1551_v53, %v1575_v14 }
 0x484   :  { %2257 = vmatpush1.bf16.msra.mxu0 %v3074_v20  ;;  %2693 = vmatpush3.bf16.msra.mxu1 %v3078_v21 }
 0x485   :  { %2258 = vmatprep.subr.bf16.mxu0 %v3081_v22  ;;  %2694 = vmatprep.subr.bf16.mxu1 %v3082_v23 }
 0x488   :  { %2259 = vmatpush1.bf16.msra.mxu0 %v3079_v24  ;;  %2695 = vmatpush3.bf16.msra.mxu1 %v3083_v25 }
 0x489   :  { %2260 = vmatprep.subr.bf16.mxu0 %v3086_v27  ;;  %2696 = vmatprep.subr.bf16.mxu1 %v3087_v30 }
 0x48c   :  { %2261 = vmatpush1.bf16.msra.mxu0 %v3084_v31  ;;  %2697 = vmatpush3.bf16.msra.mxu1 %v3088_v32 }
 0x48d   :  { %2262 = vmatprep.subr.bf16.mxu0 %v3091_v33 }
 0x48f   :  { %2320 = vmatmul.mubr.bf16.vlgmr.msra.gmra.mxu1 %v3895_v2 }
 0x490   :  { %2263 = vmatpush2.bf16.msra.mxu0 %v3089_v34 }
 0x491   :  { %2264 = vmatprep.subr.bf16.mxu0 %v3094_v35 }
 0x494   :  { %2265 = vmatpush2.bf16.msra.mxu0 %v3092_v36 }
 0x495   :  { %2266 = vmatprep.subr.bf16.mxu0 %v3097_v37 }
 0x498   :  { %2267 = vmatpush2.bf16.msra.mxu0 %v3095_v38 }
 0x499   :  { %2268 = vmatprep.subr.bf16.mxu0 %v3100_v39 }
 0x49c   :  { %2269 = vmatpush2.bf16.msra.mxu0 %v3098_v40 }
 0x49d   :  { %2270 = vmatprep.subr.bf16.mxu0 %v3103_v41 }
 0x4a0   :  { %2271 = vmatpush2.bf16.msra.mxu0 %v3101_v42 }
 0x4a1   :  { %2272 = vmatprep.subr.bf16.mxu0 %v3106_v44 }
 0x4a4   :  { %2273 = vmatpush2.bf16.msra.mxu0 %v3104_v45 }
 0x4a5   :  { %2274 = vmatprep.subr.bf16.mxu0 %v3109_v46 }
 0x4a8   :  { %2275 = vmatpush2.bf16.msra.mxu0 %v3107_v47 }
 0x4a9   :  { %2276 = vmatprep.subr.bf16.mxu0 %v3112_v49 }
 0x4ac   :  { %2277 = vmatpush2.bf16.msra.mxu0 %v3110_v50 }
 0x4af   :  { %2279 = vmatmul.mubr.bf16.vlgmr.msra.gmra.mxu0 %v3895_v2 }
 0x52f   :  { %v2198_v58 = vpop.f32.mrf.mxu0  ;;  %v2239_v59 = vpop.f32.mrf.mxu1 }
 0x530   :  { %v2199_v62 = vadd.f32 %v2198_v58, %v1556_v54  ;;  %v2240_v63 = vadd.f32 %v2239_v59, %v1564_v55 }
 0x531   :  { %v2200_v60 = vpop.f32.mrf.mxu0  ;;  %v2241_v61 = vpop.f32.mrf.mxu1 }
 0x532   :  { %v2201_v0 = vadd.f32 %v2200_v60, %v1560_v56  ;;  %v2242_v1 = vadd.f32 %v2241_v61, %v1568_v57 }
 0x533   :  { %v2202_v2 = vpop.f32.mrf.mxu0  ;;  %v2243_v3 = vpop.f32.mrf.mxu1 }
 0x534   :  { %v2334_v4 = vcombine.low %v2199_v62, %v2201_v0  ;;  %v2335_v5 = vcombine.low %v2240_v63, %v2242_v1 }
 0x535   :  { %v2203_v6 = vpop.f32.mrf.mxu0  ;;  %v2244_v7 = vpop.f32.mrf.mxu1 }
 0x536   :  { %v2342_v26 = vrot.slane %v2334_v4, %v3319_v48  ;;  %v2349_v8 = vrot.slane %v2335_v5, %v3319_v48 }
 0x538   :  { %v2350_v28 = vcombine.low %v2342_v26, %v2349_v8 }
 0x53a   :  { %2369 = vst [vmem:[%s4066_s13] sm:$0xff] %v2350_v28 }
 0x54f   :  { %v2698_v9 = vpop.f32.mrf.mxu1 }
 0x551   :  { %v2699_v10 = vpop.f32.mrf.mxu1 }
 0x552   :  { %v2700_v16 = vadd.f32 %v2699_v10, %v2698_v9 }
 0x553   :  { %v2701_v11 = vpop.f32.mrf.mxu1 }
 0x554   :  { %v2322_v21 = vadd.f32 %v2700_v16, %v1580_v15 }
 0x555   :  { %v2702_v12 = vpop.f32.mrf.mxu1 }
 0x556   :  { %v2365_v30 = vrot.slane %v2322_v21, %v3319_v48 }
 0x56f   :  { %v2280_v19 = vpop.f32.mrf.mxu0 }
 0x570   :  { %v2281_v22 = vadd.f32 %v2280_v19, %v1572_v17 }
 0x571   :  { %v2282_v20 = vpop.f32.mrf.mxu0 }
 0x572   :  { %v2283_v23 = vadd.f32 %v2282_v20, %v1576_v18 }
 0x573   :  { %v2284_v24 = vpop.f32.mrf.mxu0 }
 0x574   :  { %v2351_v25 = vcombine.low %v2281_v22, %v2283_v23 }
 0x575   :  { %v2285_v27 = vpop.f32.mrf.mxu0 }
 0x576   :  { %v2358_v43 = vrot.slane %v2351_v25, %v3319_v48 }
 0x578   :  { %v2366_v31 = vcombine.low %v2358_v43, %v2365_v30 }
 0x57a   :  { %2375 = vst.msk [vmem:[%s4066_s13 + $0x8] sm:$0x3f] %vm2374_vm6, %v2366_v31 }

</bundles_post_ra>
